<compile_context>
chip_gen: v7x
topology: tpu7x:2x2x1
jax: 0.10.0
libtpu: 0.0.40
codegen_flags: <defaults>
</compile_context>

<pallas_src>
import functools

import jax
import jax.numpy as jnp
from jax import lax
from jax.experimental import pallas as pl
from jax.experimental.pallas import tpu as pltpu


def _layer_norm(x, w, b, eps):
    mean = jnp.mean(x, axis=-1, keepdims=True)
    xc = x - mean
    var = jnp.mean(xc * xc, axis=-1, keepdims=True)
    return xc * lax.rsqrt(var + eps) * w + b


def _gelu_tanh(x):
    # TODO(synk): PyTorch nn.GELU defaults to the exact erf formulation; the tanh
    # approximation is used (difference <~1e-3) to stay on ops with guaranteed
    # Mosaic lowering (tanh on the EUP).
    c = 0.7978845608028654  # sqrt(2/pi)
    return 0.5 * x * (1.0 + jnp.tanh(c * (x + 0.044715 * x * x * x)))


def _block_kernel(x_ref, ln1_w_ref, ln1_b_ref,
                  w_qkv_ref, w_proj_ref, b_proj_ref,
                  ln2_w_ref, ln2_b_ref,
                  w_fc1_ref, b_fc1_ref, w_fc2_ref, b_fc2_ref,
                  o_ref, *, num_heads, scale, eps):
    BB, N, C = x_ref.shape
    R = BB * N
    hd = C // num_heads

    # ---- load this group of BB samples and flatten to a (R, C) row block -----
    x = x_ref[...].astype(jnp.float32).reshape(R, C)

    # ---------------------------- attention branch ----------------------------
    xn = _layer_norm(x, ln1_w_ref[...], ln1_b_ref[...], eps)

    # Fused QKV: one bf16 x bf16 matmul with f32 accumulation -> (R, 3C).
    qkv = jnp.dot(xn.astype(jnp.bfloat16), w_qkv_ref[...],
                  preferred_element_type=jnp.float32)
    q = qkv[:, :C] * scale                      # pre-scale q once (f32)
    k = qkv[:, C:2 * C]
    v = qkv[:, 2 * C:]

    # Per-sample attention: un-flatten rows back to (BB, N, C).
    q3 = q.reshape(BB, N, C)
    k3 = k.reshape(BB, N, C)
    v3 = v.reshape(BB, N, C)

    head_ctx = []
    for h in range(num_heads):                  # small static unroll over heads
        sl = slice(h * hd, (h + 1) * hd)
        qh = q3[:, :, sl].astype(jnp.bfloat16)
        kh = k3[:, :, sl].astype(jnp.bfloat16)
        vh = v3[:, :, sl].astype(jnp.bfloat16)
        # scores over all BB samples of this step at once: (BB, N, N), f32.
        s = jnp.einsum('bnd,bmd->bnm', qh, kh,
                       preferred_element_type=jnp.float32)
        s = s - jnp.max(s, axis=-1, keepdims=True)
        p = jnp.exp(s)
        inv = pl.reciprocal(jnp.sum(p, axis=-1, keepdims=True), approx=True)
        p = p * inv
        head_ctx.append(jnp.einsum('bnm,bmd->bnd', p.astype(jnp.bfloat16), vh,
                                   preferred_element_type=jnp.float32))
    ctx = jnp.concatenate(head_ctx, axis=-1).reshape(R, C)      # (R, C) f32

    attn = jnp.dot(ctx.astype(jnp.bfloat16), w_proj_ref[...],
                   preferred_element_type=jnp.float32) + b_proj_ref[...]

    y = x + attn                                                # residual 1 (f32)

    # ------------------------------- MLP branch -------------------------------
    yn = _layer_norm(y, ln2_w_ref[...], ln2_b_ref[...], eps)
    hid = jnp.dot(yn.astype(jnp.bfloat16), w_fc1_ref[...],
                  preferred_element_type=jnp.float32) + b_fc1_ref[...]
    hid = _gelu_tanh(hid)
    mlp = jnp.dot(hid.astype(jnp.bfloat16), w_fc2_ref[...],
                  preferred_element_type=jnp.float32) + b_fc2_ref[...]

    out = y + mlp                                               # residual 2 (f32)
    o_ref[...] = out.reshape(BB, N, C).astype(o_ref.dtype)


def _pick_block_batch(B, N):
    """Largest divisor of B giving ~256 rows/step while keeping grid length >= 2."""
    target_rows = 256
    cap = max(1, target_rows // max(N, 1))
    if B >= 2:
        cap = min(cap, max(B // 2, 1))          # keep >= 2 grid steps (megacore)
    bb = max(1, min(cap, B))
    while B % bb:
        bb -= 1
    return bb


def vit_block(x, params, *, num_heads, block_batch=None):
    """Fused transformer Block forward.  x: (B, N, C) float32."""
    B, N, C = x.shape
    assert C % num_heads == 0
    hd = C // num_heads
    scale = hd ** -0.5
    eps = 1e-5                                   # nn.LayerNorm default

    bb = block_batch if block_batch is not None else _pick_block_batch(B, N)
    assert B % bb == 0
    grid = (B // bb,)

    wmx = jnp.bfloat16                           # MXU operand dtype for weights

    def row(v):                                  # (D,) -> (1, D): lane-major 2D
        return v.reshape(1, -1)

    inputs = (
        x,
        row(params["ln1_w"]), row(params["ln1_b"]),
        params["w_qkv"].astype(wmx),
        params["w_proj"].astype(wmx), row(params["b_proj"]),
        row(params["ln2_w"]), row(params["ln2_b"]),
        params["w_fc1"].astype(wmx), row(params["b_fc1"]),
        params["w_fc2"].astype(wmx), row(params["b_fc2"]),
    )

    # Weights/params: full-array blocks with constant index maps -> VMEM resident.
    in_specs = [pl.BlockSpec((bb, N, C), lambda g: (g, 0, 0))]
    in_specs += [pl.BlockSpec(a.shape, lambda g: (0, 0)) for a in inputs[1:]]
    out_spec = pl.BlockSpec((bb, N, C), lambda g: (g, 0, 0))

    kernel = functools.partial(_block_kernel, num_heads=num_heads,
                               scale=scale, eps=eps)

    return pl.pallas_call(
        kernel,
        out_shape=jax.ShapeDtypeStruct((B, N, C), x.dtype),
        grid=grid,
        in_specs=in_specs,
        out_specs=out_spec,
        compiler_params=pltpu.CompilerParams(
            dimension_semantics=("parallel",),
            vmem_limit_bytes=32 * 1024 * 1024),
    )(*inputs)


def _block_ref(x, params, num_heads):
    """Pure-JAX f32 reference (same math, HIGHEST-precision matmuls)."""
    eps = 1e-5
    hi = lax.Precision.HIGHEST
    B, N, C = x.shape
    hd = C // num_heads
    scale = hd ** -0.5

    def ln(z, w, b):
        mu = jnp.mean(z, -1, keepdims=True)
        var = jnp.mean((z - mu) ** 2, -1, keepdims=True)
        return (z - mu) * lax.rsqrt(var + eps) * w + b

    xn = ln(x, params["ln1_w"], params["ln1_b"])
    qkv = jnp.einsum("bnc,cd->bnd", xn, params["w_qkv"], precision=hi)
    qkv = qkv.reshape(B, N, 3, num_heads, hd).transpose(2, 0, 3, 1, 4)
    q, k, v = qkv[0], qkv[1], qkv[2]
    attn = jnp.einsum("bhqd,bhkd->bhqk", q, k, precision=hi) * scale
    attn = jax.nn.softmax(attn, axis=-1)
    o = jnp.einsum("bhqk,bhkd->bhqd", attn, v, precision=hi)
    o = o.transpose(0, 2, 1, 3).reshape(B, N, C)
    o = jnp.einsum("bnc,cd->bnd", o, params["w_proj"], precision=hi) + params["b_proj"]
    y = x + o
    yn = ln(y, params["ln2_w"], params["ln2_b"])
    h = jnp.einsum("bnc,ch->bnh", yn, params["w_fc1"], precision=hi) + params["b_fc1"]
    h = 0.5 * h * (1.0 + jnp.tanh(0.7978845608028654 * (h + 0.044715 * h ** 3)))
    m = jnp.einsum("bnh,hc->bnc", h, params["w_fc2"], precision=hi) + params["b_fc2"]
    return y + m


if __name__ == "__main__":
    key = jax.random.PRNGKey(0)
    B, N, C, num_heads = 8, 8, 128, 4          # small, lane-dense demo shapes
    H = int(C * 4.0)                           # mlp_ratio = 4.0 -> 512
    ks = jax.random.split(key, 12)

    params = {
        "ln1_w": 1.0 + 0.1 * jax.random.normal(ks[0], (C,), jnp.float32),
        "ln1_b": 0.1 * jax.random.normal(ks[1], (C,), jnp.float32),
        "w_qkv": 0.06 * jax.random.normal(ks[2], (C, 3 * C), jnp.float32),
        "w_proj": 0.06 * jax.random.normal(ks[3], (C, C), jnp.float32),
        "b_proj": 0.05 * jax.random.normal(ks[4], (C,), jnp.float32),
        "ln2_w": 1.0 + 0.1 * jax.random.normal(ks[5], (C,), jnp.float32),
        "ln2_b": 0.1 * jax.random.normal(ks[6], (C,), jnp.float32),
        "w_fc1": 0.06 * jax.random.normal(ks[7], (C, H), jnp.float32),
        "b_fc1": 0.05 * jax.random.normal(ks[8], (H,), jnp.float32),
        "w_fc2": 0.06 * jax.random.normal(ks[9], (H, C), jnp.float32),
        "b_fc2": 0.05 * jax.random.normal(ks[10], (C,), jnp.float32),
    }
    x = jax.random.normal(ks[11], (B, N, C), dtype=jnp.float32)

    y = vit_block(x, params, num_heads=num_heads)
    y = jax.block_until_ready(y)

    y_ref = _block_ref(x, params, num_heads)
    assert y.shape == x.shape and y.dtype == x.dtype
    max_err = float(jnp.max(jnp.abs(y - y_ref)))
    # Tolerance sized for bf16 MXU operands with f32 accumulation vs f32 reference.
    assert jnp.allclose(y, y_ref, atol=2e-2, rtol=2e-2), f"max abs err = {max_err}"

    print("KERNEL_OK")
</pallas_src>

<mosaic_0001>
module attributes {stable_mosaic.version = 11 : i64} {
  func.func @_block_kernel(%arg0: i32, %arg1: memref<4x8x128xf32, #tpu.memory_space<vmem>>, %arg2: memref<1x128xf32, #tpu.memory_space<vmem>>, %arg3: memref<1x128xf32, #tpu.memory_space<vmem>>, %arg4: memref<128x384xbf16, #tpu.memory_space<vmem>>, %arg5: memref<128x128xbf16, #tpu.memory_space<vmem>>, %arg6: memref<1x128xf32, #tpu.memory_space<vmem>>, %arg7: memref<1x128xf32, #tpu.memory_space<vmem>>, %arg8: memref<1x128xf32, #tpu.memory_space<vmem>>, %arg9: memref<128x512xbf16, #tpu.memory_space<vmem>>, %arg10: memref<1x512xf32, #tpu.memory_space<vmem>>, %arg11: memref<512x128xbf16, #tpu.memory_space<vmem>>, %arg12: memref<1x128xf32, #tpu.memory_space<vmem>>, %arg13: memref<4x8x128xf32, #tpu.memory_space<vmem>>) attributes {dimension_semantics = [#tpu.dimension_semantics<parallel>], iteration_bounds = array<i64: 2>, scalar_prefetch = 0 : i64, scratch_operands = 0 : i64, tpu.core_type = #tpu.core_type<tc>, window_params = [{transform_indices = @transform_0, window_bounds = array<i64: 4, 8, 128>}, {pipeline_mode = #tpu.pipeline_mode<synchronous>, transform_indices = @transform_1, window_bounds = array<i64: 1, 128>}, {pipeline_mode = #tpu.pipeline_mode<synchronous>, transform_indices = @transform_2, window_bounds = array<i64: 1, 128>}, {pipeline_mode = #tpu.pipeline_mode<synchronous>, transform_indices = @transform_3, window_bounds = array<i64: 128, 384>}, {pipeline_mode = #tpu.pipeline_mode<synchronous>, transform_indices = @transform_4, window_bounds = array<i64: 128, 128>}, {pipeline_mode = #tpu.pipeline_mode<synchronous>, transform_indices = @transform_5, window_bounds = array<i64: 1, 128>}, {pipeline_mode = #tpu.pipeline_mode<synchronous>, transform_indices = @transform_6, window_bounds = array<i64: 1, 128>}, {pipeline_mode = #tpu.pipeline_mode<synchronous>, transform_indices = @transform_7, window_bounds = array<i64: 1, 128>}, {pipeline_mode = #tpu.pipeline_mode<synchronous>, transform_indices = @transform_8, window_bounds = array<i64: 128, 512>}, {pipeline_mode = #tpu.pipeline_mode<synchronous>, transform_indices = @transform_9, window_bounds = array<i64: 1, 512>}, {pipeline_mode = #tpu.pipeline_mode<synchronous>, transform_indices = @transform_10, window_bounds = array<i64: 512, 128>}, {pipeline_mode = #tpu.pipeline_mode<synchronous>, transform_indices = @transform_11, window_bounds = array<i64: 1, 128>}, {transform_indices = @transform_12, window_bounds = array<i64: 4, 8, 128>}]} {
    %c0 = arith.constant 0 : index
    %c0_0 = arith.constant 0 : index
    %c0_1 = arith.constant 0 : index
    %0 = vector.load %arg1[%c0, %c0_0, %c0_1] : memref<4x8x128xf32, #tpu.memory_space<vmem>>, vector<4x8x128xf32>
    %1 = vector.shape_cast %0 : vector<4x8x128xf32> to vector<32x128xf32>
    %c0_2 = arith.constant 0 : index
    %c0_3 = arith.constant 0 : index
    %2 = vector.load %arg2[%c0_2, %c0_3] : memref<1x128xf32, #tpu.memory_space<vmem>>, vector<1x128xf32>
    %c0_4 = arith.constant 0 : index
    %c0_5 = arith.constant 0 : index
    %3 = vector.load %arg3[%c0_4, %c0_5] : memref<1x128xf32, #tpu.memory_space<vmem>>, vector<1x128xf32>
    %cst = arith.constant dense<0.000000e+00> : vector<32xf32>
    %4 = vector.multi_reduction <add>, %1, %cst [1] : vector<32x128xf32> to vector<32xf32>
    %5 = vector.shape_cast %4 : vector<32xf32> to vector<32x1xf32>
    %cst_6 = arith.constant 1.280000e+02 : f32
    %6 = vector.broadcast %cst_6 : f32 to vector<32x1xf32>
    %7 = arith.divf %5, %6 : vector<32x1xf32>
    %8 = vector.broadcast %7 : vector<32x1xf32> to vector<32x128xf32>
    %9 = arith.subf %1, %8 : vector<32x128xf32>
    %10 = arith.mulf %9, %9 : vector<32x128xf32>
    %cst_7 = arith.constant dense<0.000000e+00> : vector<32xf32>
    %11 = vector.multi_reduction <add>, %10, %cst_7 [1] : vector<32x128xf32> to vector<32xf32>
    %12 = vector.shape_cast %11 : vector<32xf32> to vector<32x1xf32>
    %cst_8 = arith.constant 1.280000e+02 : f32
    %13 = vector.broadcast %cst_8 : f32 to vector<32x1xf32>
    %14 = arith.divf %12, %13 : vector<32x1xf32>
    %cst_9 = arith.constant 9.99999974E-6 : f32
    %15 = vector.broadcast %cst_9 : f32 to vector<32x1xf32>
    %16 = arith.addf %14, %15 : vector<32x1xf32>
    %17 = math.rsqrt %16 : vector<32x1xf32>
    %18 = vector.broadcast %17 : vector<32x1xf32> to vector<32x128xf32>
    %19 = arith.mulf %9, %18 : vector<32x128xf32>
    %20 = vector.broadcast %2 : vector<1x128xf32> to vector<32x128xf32>
    %21 = arith.mulf %19, %20 : vector<32x128xf32>
    %22 = vector.broadcast %3 : vector<1x128xf32> to vector<32x128xf32>
    %23 = arith.addf %21, %22 : vector<32x128xf32>
    %24 = arith.truncf %23 : vector<32x128xf32> to vector<32x128xbf16>
    %c0_10 = arith.constant 0 : index
    %c0_11 = arith.constant 0 : index
    %25 = vector.load %arg4[%c0_10, %c0_11] : memref<128x384xbf16, #tpu.memory_space<vmem>>, vector<128x384xbf16>
    %cst_12 = arith.constant dense<0.000000e+00> : vector<32x384xf32>
    %26 = tpu.matmul %24, %25, %cst_12 {dimension_numbers = #tpu.dot_dimension_numbers<[1], [0], [0], [1], [0, 0, 1, 1], [], []>} : vector<32x128xbf16>, vector<128x384xbf16>, vector<32x384xf32> -> vector<32x384xf32>
    %27 = vector.extract_strided_slice %26 {offsets = [0, 0], sizes = [32, 128], strides = [1, 1]} : vector<32x384xf32> to vector<32x128xf32>
    %cst_13 = arith.constant 0.176776692 : f32
    %28 = vector.broadcast %cst_13 : f32 to vector<32x128xf32>
    %29 = arith.mulf %27, %28 : vector<32x128xf32>
    %30 = vector.extract_strided_slice %26 {offsets = [0, 128], sizes = [32, 128], strides = [1, 1]} : vector<32x384xf32> to vector<32x128xf32>
    %31 = vector.extract_strided_slice %26 {offsets = [0, 256], sizes = [32, 128], strides = [1, 1]} : vector<32x384xf32> to vector<32x128xf32>
    %32 = vector.shape_cast %29 : vector<32x128xf32> to vector<4x8x128xf32>
    %33 = vector.shape_cast %30 : vector<32x128xf32> to vector<4x8x128xf32>
    %34 = vector.shape_cast %31 : vector<32x128xf32> to vector<4x8x128xf32>
    %35 = vector.extract_strided_slice %32 {offsets = [0, 0, 0], sizes = [4, 8, 32], strides = [1, 1, 1]} : vector<4x8x128xf32> to vector<4x8x32xf32>
    %36 = arith.truncf %35 : vector<4x8x32xf32> to vector<4x8x32xbf16>
    %37 = vector.extract_strided_slice %33 {offsets = [0, 0, 0], sizes = [4, 8, 32], strides = [1, 1, 1]} : vector<4x8x128xf32> to vector<4x8x32xf32>
    %38 = arith.truncf %37 : vector<4x8x32xf32> to vector<4x8x32xbf16>
    %39 = vector.extract_strided_slice %34 {offsets = [0, 0, 0], sizes = [4, 8, 32], strides = [1, 1, 1]} : vector<4x8x128xf32> to vector<4x8x32xf32>
    %40 = arith.truncf %39 : vector<4x8x32xf32> to vector<4x8x32xbf16>
    "tpu.trace_start"() <{level = 10 : i32, message = "bnd,bmd->bnm"}> : () -> ()
    %cst_14 = arith.constant dense<0.000000e+00> : vector<4x8x8xf32>
    %41 = tpu.matmul %36, %38, %cst_14 {dimension_numbers = #tpu.dot_dimension_numbers<[2], [2], [1], [1], [0, 0, 0, 1, 1, 1], [0], [0]>} : vector<4x8x32xbf16>, vector<4x8x32xbf16>, vector<4x8x8xf32> -> vector<4x8x8xf32>
    "tpu.trace_stop"() : () -> ()
    %cst_15 = arith.constant dense<0xFF800000> : vector<4x8xf32>
    %42 = vector.multi_reduction <maximumf>, %41, %cst_15 [2] : vector<4x8x8xf32> to vector<4x8xf32>
    %43 = vector.shape_cast %42 : vector<4x8xf32> to vector<4x8x1xf32>
    %44 = vector.broadcast %43 : vector<4x8x1xf32> to vector<4x8x8xf32>
    %45 = arith.subf %41, %44 : vector<4x8x8xf32>
    %46 = math.exp %45 : vector<4x8x8xf32>
    %cst_16 = arith.constant dense<0.000000e+00> : vector<4x8xf32>
    %47 = vector.multi_reduction <add>, %46, %cst_16 [2] : vector<4x8x8xf32> to vector<4x8xf32>
    %48 = vector.shape_cast %47 : vector<4x8xf32> to vector<4x8x1xf32>
    %49 = tpu.reciprocal %48 {approx = true} : vector<4x8x1xf32> -> vector<4x8x1xf32>
    %50 = vector.broadcast %49 : vector<4x8x1xf32> to vector<4x8x8xf32>
    %51 = arith.mulf %46, %50 : vector<4x8x8xf32>
    %52 = arith.truncf %51 : vector<4x8x8xf32> to vector<4x8x8xbf16>
    "tpu.trace_start"() <{level = 10 : i32, message = "bnm,bmd->bnd"}> : () -> ()
    %cst_17 = arith.constant dense<0.000000e+00> : vector<4x8x32xf32>
    %53 = tpu.matmul %52, %40, %cst_17 {dimension_numbers = #tpu.dot_dimension_numbers<[2], [1], [1], [2], [0, 0, 0, 1, 1, 2], [0], [0]>} : vector<4x8x8xbf16>, vector<4x8x32xbf16>, vector<4x8x32xf32> -> vector<4x8x32xf32>
    "tpu.trace_stop"() : () -> ()
    %54 = vector.extract_strided_slice %32 {offsets = [0, 0, 32], sizes = [4, 8, 32], strides = [1, 1, 1]} : vector<4x8x128xf32> to vector<4x8x32xf32>
    %55 = arith.truncf %54 : vector<4x8x32xf32> to vector<4x8x32xbf16>
    %56 = vector.extract_strided_slice %33 {offsets = [0, 0, 32], sizes = [4, 8, 32], strides = [1, 1, 1]} : vector<4x8x128xf32> to vector<4x8x32xf32>
    %57 = arith.truncf %56 : vector<4x8x32xf32> to vector<4x8x32xbf16>
    %58 = vector.extract_strided_slice %34 {offsets = [0, 0, 32], sizes = [4, 8, 32], strides = [1, 1, 1]} : vector<4x8x128xf32> to vector<4x8x32xf32>
    %59 = arith.truncf %58 : vector<4x8x32xf32> to vector<4x8x32xbf16>
    "tpu.trace_start"() <{level = 10 : i32, message = "bnd,bmd->bnm"}> : () -> ()
    %cst_18 = arith.constant dense<0.000000e+00> : vector<4x8x8xf32>
    %60 = tpu.matmul %55, %57, %cst_18 {dimension_numbers = #tpu.dot_dimension_numbers<[2], [2], [1], [1], [0, 0, 0, 1, 1, 1], [0], [0]>} : vector<4x8x32xbf16>, vector<4x8x32xbf16>, vector<4x8x8xf32> -> vector<4x8x8xf32>
    "tpu.trace_stop"() : () -> ()
    %cst_19 = arith.constant dense<0xFF800000> : vector<4x8xf32>
    %61 = vector.multi_reduction <maximumf>, %60, %cst_19 [2] : vector<4x8x8xf32> to vector<4x8xf32>
    %62 = vector.shape_cast %61 : vector<4x8xf32> to vector<4x8x1xf32>
    %63 = vector.broadcast %62 : vector<4x8x1xf32> to vector<4x8x8xf32>
    %64 = arith.subf %60, %63 : vector<4x8x8xf32>
    %65 = math.exp %64 : vector<4x8x8xf32>
    %cst_20 = arith.constant dense<0.000000e+00> : vector<4x8xf32>
    %66 = vector.multi_reduction <add>, %65, %cst_20 [2] : vector<4x8x8xf32> to vector<4x8xf32>
    %67 = vector.shape_cast %66 : vector<4x8xf32> to vector<4x8x1xf32>
    %68 = tpu.reciprocal %67 {approx = true} : vector<4x8x1xf32> -> vector<4x8x1xf32>
    %69 = vector.broadcast %68 : vector<4x8x1xf32> to vector<4x8x8xf32>
    %70 = arith.mulf %65, %69 : vector<4x8x8xf32>
    %71 = arith.truncf %70 : vector<4x8x8xf32> to vector<4x8x8xbf16>
    "tpu.trace_start"() <{level = 10 : i32, message = "bnm,bmd->bnd"}> : () -> ()
    %cst_21 = arith.constant dense<0.000000e+00> : vector<4x8x32xf32>
    %72 = tpu.matmul %71, %59, %cst_21 {dimension_numbers = #tpu.dot_dimension_numbers<[2], [1], [1], [2], [0, 0, 0, 1, 1, 2], [0], [0]>} : vector<4x8x8xbf16>, vector<4x8x32xbf16>, vector<4x8x32xf32> -> vector<4x8x32xf32>
    "tpu.trace_stop"() : () -> ()
    %73 = vector.extract_strided_slice %32 {offsets = [0, 0, 64], sizes = [4, 8, 32], strides = [1, 1, 1]} : vector<4x8x128xf32> to vector<4x8x32xf32>
    %74 = arith.truncf %73 : vector<4x8x32xf32> to vector<4x8x32xbf16>
    %75 = vector.extract_strided_slice %33 {offsets = [0, 0, 64], sizes = [4, 8, 32], strides = [1, 1, 1]} : vector<4x8x128xf32> to vector<4x8x32xf32>
    %76 = arith.truncf %75 : vector<4x8x32xf32> to vector<4x8x32xbf16>
    %77 = vector.extract_strided_slice %34 {offsets = [0, 0, 64], sizes = [4, 8, 32], strides = [1, 1, 1]} : vector<4x8x128xf32> to vector<4x8x32xf32>
    %78 = arith.truncf %77 : vector<4x8x32xf32> to vector<4x8x32xbf16>
    "tpu.trace_start"() <{level = 10 : i32, message = "bnd,bmd->bnm"}> : () -> ()
    %cst_22 = arith.constant dense<0.000000e+00> : vector<4x8x8xf32>
    %79 = tpu.matmul %74, %76, %cst_22 {dimension_numbers = #tpu.dot_dimension_numbers<[2], [2], [1], [1], [0, 0, 0, 1, 1, 1], [0], [0]>} : vector<4x8x32xbf16>, vector<4x8x32xbf16>, vector<4x8x8xf32> -> vector<4x8x8xf32>
    "tpu.trace_stop"() : () -> ()
    %cst_23 = arith.constant dense<0xFF800000> : vector<4x8xf32>
    %80 = vector.multi_reduction <maximumf>, %79, %cst_23 [2] : vector<4x8x8xf32> to vector<4x8xf32>
    %81 = vector.shape_cast %80 : vector<4x8xf32> to vector<4x8x1xf32>
    %82 = vector.broadcast %81 : vector<4x8x1xf32> to vector<4x8x8xf32>
    %83 = arith.subf %79, %82 : vector<4x8x8xf32>
    %84 = math.exp %83 : vector<4x8x8xf32>
    %cst_24 = arith.constant dense<0.000000e+00> : vector<4x8xf32>
    %85 = vector.multi_reduction <add>, %84, %cst_24 [2] : vector<4x8x8xf32> to vector<4x8xf32>
    %86 = vector.shape_cast %85 : vector<4x8xf32> to vector<4x8x1xf32>
    %87 = tpu.reciprocal %86 {approx = true} : vector<4x8x1xf32> -> vector<4x8x1xf32>
    %88 = vector.broadcast %87 : vector<4x8x1xf32> to vector<4x8x8xf32>
    %89 = arith.mulf %84, %88 : vector<4x8x8xf32>
    %90 = arith.truncf %89 : vector<4x8x8xf32> to vector<4x8x8xbf16>
    "tpu.trace_start"() <{level = 10 : i32, message = "bnm,bmd->bnd"}> : () -> ()
    %cst_25 = arith.constant dense<0.000000e+00> : vector<4x8x32xf32>
    %91 = tpu.matmul %90, %78, %cst_25 {dimension_numbers = #tpu.dot_dimension_numbers<[2], [1], [1], [2], [0, 0, 0, 1, 1, 2], [0], [0]>} : vector<4x8x8xbf16>, vector<4x8x32xbf16>, vector<4x8x32xf32> -> vector<4x8x32xf32>
    "tpu.trace_stop"() : () -> ()
    %92 = vector.extract_strided_slice %32 {offsets = [0, 0, 96], sizes = [4, 8, 32], strides = [1, 1, 1]} : vector<4x8x128xf32> to vector<4x8x32xf32>
    %93 = arith.truncf %92 : vector<4x8x32xf32> to vector<4x8x32xbf16>
    %94 = vector.extract_strided_slice %33 {offsets = [0, 0, 96], sizes = [4, 8, 32], strides = [1, 1, 1]} : vector<4x8x128xf32> to vector<4x8x32xf32>
    %95 = arith.truncf %94 : vector<4x8x32xf32> to vector<4x8x32xbf16>
    %96 = vector.extract_strided_slice %34 {offsets = [0, 0, 96], sizes = [4, 8, 32], strides = [1, 1, 1]} : vector<4x8x128xf32> to vector<4x8x32xf32>
    %97 = arith.truncf %96 : vector<4x8x32xf32> to vector<4x8x32xbf16>
    "tpu.trace_start"() <{level = 10 : i32, message = "bnd,bmd->bnm"}> : () -> ()
    %cst_26 = arith.constant dense<0.000000e+00> : vector<4x8x8xf32>
    %98 = tpu.matmul %93, %95, %cst_26 {dimension_numbers = #tpu.dot_dimension_numbers<[2], [2], [1], [1], [0, 0, 0, 1, 1, 1], [0], [0]>} : vector<4x8x32xbf16>, vector<4x8x32xbf16>, vector<4x8x8xf32> -> vector<4x8x8xf32>
    "tpu.trace_stop"() : () -> ()
    %cst_27 = arith.constant dense<0xFF800000> : vector<4x8xf32>
    %99 = vector.multi_reduction <maximumf>, %98, %cst_27 [2] : vector<4x8x8xf32> to vector<4x8xf32>
    %100 = vector.shape_cast %99 : vector<4x8xf32> to vector<4x8x1xf32>
    %101 = vector.broadcast %100 : vector<4x8x1xf32> to vector<4x8x8xf32>
    %102 = arith.subf %98, %101 : vector<4x8x8xf32>
    %103 = math.exp %102 : vector<4x8x8xf32>
    %cst_28 = arith.constant dense<0.000000e+00> : vector<4x8xf32>
    %104 = vector.multi_reduction <add>, %103, %cst_28 [2] : vector<4x8x8xf32> to vector<4x8xf32>
    %105 = vector.shape_cast %104 : vector<4x8xf32> to vector<4x8x1xf32>
    %106 = tpu.reciprocal %105 {approx = true} : vector<4x8x1xf32> -> vector<4x8x1xf32>
    %107 = vector.broadcast %106 : vector<4x8x1xf32> to vector<4x8x8xf32>
    %108 = arith.mulf %103, %107 : vector<4x8x8xf32>
    %109 = arith.truncf %108 : vector<4x8x8xf32> to vector<4x8x8xbf16>
    "tpu.trace_start"() <{level = 10 : i32, message = "bnm,bmd->bnd"}> : () -> ()
    %cst_29 = arith.constant dense<0.000000e+00> : vector<4x8x32xf32>
    %110 = tpu.matmul %109, %97, %cst_29 {dimension_numbers = #tpu.dot_dimension_numbers<[2], [1], [1], [2], [0, 0, 0, 1, 1, 2], [0], [0]>} : vector<4x8x8xbf16>, vector<4x8x32xbf16>, vector<4x8x32xf32> -> vector<4x8x32xf32>
    "tpu.trace_stop"() : () -> ()
    %111 = tpu.concatenate %53, %72, %91, %110 in 2 : vector<4x8x32xf32>, vector<4x8x32xf32>, vector<4x8x32xf32>, vector<4x8x32xf32> -> vector<4x8x128xf32>
    %112 = vector.shape_cast %111 : vector<4x8x128xf32> to vector<32x128xf32>
    %113 = arith.truncf %112 : vector<32x128xf32> to vector<32x128xbf16>
    %c0_30 = arith.constant 0 : index
    %c0_31 = arith.constant 0 : index
    %114 = vector.load %arg5[%c0_30, %c0_31] : memref<128x128xbf16, #tpu.memory_space<vmem>>, vector<128x128xbf16>
    %cst_32 = arith.constant dense<0.000000e+00> : vector<32x128xf32>
    %115 = tpu.matmul %113, %114, %cst_32 {dimension_numbers = #tpu.dot_dimension_numbers<[1], [0], [0], [1], [0, 0, 1, 1], [], []>} : vector<32x128xbf16>, vector<128x128xbf16>, vector<32x128xf32> -> vector<32x128xf32>
    %c0_33 = arith.constant 0 : index
    %c0_34 = arith.constant 0 : index
    %116 = vector.load %arg6[%c0_33, %c0_34] : memref<1x128xf32, #tpu.memory_space<vmem>>, vector<1x128xf32>
    %117 = vector.broadcast %116 : vector<1x128xf32> to vector<32x128xf32>
    %118 = arith.addf %115, %117 : vector<32x128xf32>
    %119 = arith.addf %1, %118 : vector<32x128xf32>
    %c0_35 = arith.constant 0 : index
    %c0_36 = arith.constant 0 : index
    %120 = vector.load %arg7[%c0_35, %c0_36] : memref<1x128xf32, #tpu.memory_space<vmem>>, vector<1x128xf32>
    %c0_37 = arith.constant 0 : index
    %c0_38 = arith.constant 0 : index
    %121 = vector.load %arg8[%c0_37, %c0_38] : memref<1x128xf32, #tpu.memory_space<vmem>>, vector<1x128xf32>
    %cst_39 = arith.constant dense<0.000000e+00> : vector<32xf32>
    %122 = vector.multi_reduction <add>, %119, %cst_39 [1] : vector<32x128xf32> to vector<32xf32>
    %123 = vector.shape_cast %122 : vector<32xf32> to vector<32x1xf32>
    %cst_40 = arith.constant 1.280000e+02 : f32
    %124 = vector.broadcast %cst_40 : f32 to vector<32x1xf32>
    %125 = arith.divf %123, %124 : vector<32x1xf32>
    %126 = vector.broadcast %125 : vector<32x1xf32> to vector<32x128xf32>
    %127 = arith.subf %119, %126 : vector<32x128xf32>
    %128 = arith.mulf %127, %127 : vector<32x128xf32>
    %cst_41 = arith.constant dense<0.000000e+00> : vector<32xf32>
    %129 = vector.multi_reduction <add>, %128, %cst_41 [1] : vector<32x128xf32> to vector<32xf32>
    %130 = vector.shape_cast %129 : vector<32xf32> to vector<32x1xf32>
    %cst_42 = arith.constant 1.280000e+02 : f32
    %131 = vector.broadcast %cst_42 : f32 to vector<32x1xf32>
    %132 = arith.divf %130, %131 : vector<32x1xf32>
    %cst_43 = arith.constant 9.99999974E-6 : f32
    %133 = vector.broadcast %cst_43 : f32 to vector<32x1xf32>
    %134 = arith.addf %132, %133 : vector<32x1xf32>
    %135 = math.rsqrt %134 : vector<32x1xf32>
    %136 = vector.broadcast %135 : vector<32x1xf32> to vector<32x128xf32>
    %137 = arith.mulf %127, %136 : vector<32x128xf32>
    %138 = vector.broadcast %120 : vector<1x128xf32> to vector<32x128xf32>
    %139 = arith.mulf %137, %138 : vector<32x128xf32>
    %140 = vector.broadcast %121 : vector<1x128xf32> to vector<32x128xf32>
    %141 = arith.addf %139, %140 : vector<32x128xf32>
    %142 = arith.truncf %141 : vector<32x128xf32> to vector<32x128xbf16>
    %c0_44 = arith.constant 0 : index
    %c0_45 = arith.constant 0 : index
    %143 = vector.load %arg9[%c0_44, %c0_45] : memref<128x512xbf16, #tpu.memory_space<vmem>>, vector<128x512xbf16>
    %cst_46 = arith.constant dense<0.000000e+00> : vector<32x512xf32>
    %144 = tpu.matmul %142, %143, %cst_46 {dimension_numbers = #tpu.dot_dimension_numbers<[1], [0], [0], [1], [0, 0, 1, 1], [], []>} : vector<32x128xbf16>, vector<128x512xbf16>, vector<32x512xf32> -> vector<32x512xf32>
    %c0_47 = arith.constant 0 : index
    %c0_48 = arith.constant 0 : index
    %145 = vector.load %arg10[%c0_47, %c0_48] : memref<1x512xf32, #tpu.memory_space<vmem>>, vector<1x512xf32>
    %146 = vector.broadcast %145 : vector<1x512xf32> to vector<32x512xf32>
    %147 = arith.addf %144, %146 : vector<32x512xf32>
    %cst_49 = arith.constant 5.000000e-01 : f32
    %148 = vector.broadcast %cst_49 : f32 to vector<32x512xf32>
    %149 = arith.mulf %148, %147 : vector<32x512xf32>
    %cst_50 = arith.constant 4.471500e-02 : f32
    %150 = vector.broadcast %cst_50 : f32 to vector<32x512xf32>
    %151 = arith.mulf %150, %147 : vector<32x512xf32>
    %152 = arith.mulf %151, %147 : vector<32x512xf32>
    %153 = arith.mulf %152, %147 : vector<32x512xf32>
    %154 = arith.addf %147, %153 : vector<32x512xf32>
    %cst_51 = arith.constant 0.797884583 : f32
    %155 = vector.broadcast %cst_51 : f32 to vector<32x512xf32>
    %156 = arith.mulf %155, %154 : vector<32x512xf32>
    %157 = math.tanh %156 : vector<32x512xf32>
    %cst_52 = arith.constant 1.000000e+00 : f32
    %158 = vector.broadcast %cst_52 : f32 to vector<32x512xf32>
    %159 = arith.addf %158, %157 : vector<32x512xf32>
    %160 = arith.mulf %149, %159 : vector<32x512xf32>
    %161 = arith.truncf %160 : vector<32x512xf32> to vector<32x512xbf16>
    %c0_53 = arith.constant 0 : index
    %c0_54 = arith.constant 0 : index
    %162 = vector.load %arg11[%c0_53, %c0_54] : memref<512x128xbf16, #tpu.memory_space<vmem>>, vector<512x128xbf16>
    %cst_55 = arith.constant dense<0.000000e+00> : vector<32x128xf32>
    %163 = tpu.matmul %161, %162, %cst_55 {dimension_numbers = #tpu.dot_dimension_numbers<[1], [0], [0], [1], [0, 0, 1, 1], [], []>} : vector<32x512xbf16>, vector<512x128xbf16>, vector<32x128xf32> -> vector<32x128xf32>
    %c0_56 = arith.constant 0 : index
    %c0_57 = arith.constant 0 : index
    %164 = vector.load %arg12[%c0_56, %c0_57] : memref<1x128xf32, #tpu.memory_space<vmem>>, vector<1x128xf32>
    %165 = vector.broadcast %164 : vector<1x128xf32> to vector<32x128xf32>
    %166 = arith.addf %163, %165 : vector<32x128xf32>
    %167 = arith.addf %119, %166 : vector<32x128xf32>
    %168 = vector.shape_cast %167 : vector<32x128xf32> to vector<4x8x128xf32>
    %c0_58 = arith.constant 0 : index
    %c0_59 = arith.constant 0 : index
    %c0_60 = arith.constant 0 : index
    %169 = vector.load %arg13[%c0_58, %c0_59, %c0_60] : memref<4x8x128xf32, #tpu.memory_space<vmem>>, vector<4x8x128xf32>
    tpu.vector_store %arg13[%c0_58, %c0_59, %c0_60], %168 {strides = array<i32>} : memref<4x8x128xf32, #tpu.memory_space<vmem>>, vector<4x8x128xf32>,
    return
  }
  func.func @transform_0(%arg0: i32) -> (i32, i32, i32) {
    %c0_i32 = arith.constant 0 : i32
    %c0_i32_0 = arith.constant 0 : i32
    %c0_i32_1 = arith.constant 0 : i32
    return %arg0, %c0_i32, %c0_i32_0 : i32, i32, i32
  }
  func.func @transform_1(%arg0: i32) -> (i32, i32) {
    %c0_i32 = arith.constant 0 : i32
    %c0_i32_0 = arith.constant 0 : i32
    %c0_i32_1 = arith.constant 0 : i32
    return %c0_i32, %c0_i32_0 : i32, i32
  }
  func.func @transform_2(%arg0: i32) -> (i32, i32) {
    %c0_i32 = arith.constant 0 : i32
    %c0_i32_0 = arith.constant 0 : i32
    %c0_i32_1 = arith.constant 0 : i32
    return %c0_i32, %c0_i32_0 : i32, i32
  }
  func.func @transform_3(%arg0: i32) -> (i32, i32) {
    %c0_i32 = arith.constant 0 : i32
    %c0_i32_0 = arith.constant 0 : i32
    %c0_i32_1 = arith.constant 0 : i32
    return %c0_i32, %c0_i32_0 : i32, i32
  }
  func.func @transform_4(%arg0: i32) -> (i32, i32) {
    %c0_i32 = arith.constant 0 : i32
    %c0_i32_0 = arith.constant 0 : i32
    %c0_i32_1 = arith.constant 0 : i32
    return %c0_i32, %c0_i32_0 : i32, i32
  }
  func.func @transform_5(%arg0: i32) -> (i32, i32) {
    %c0_i32 = arith.constant 0 : i32
    %c0_i32_0 = arith.constant 0 : i32
    %c0_i32_1 = arith.constant 0 : i32
    return %c0_i32, %c0_i32_0 : i32, i32
  }
  func.func @transform_6(%arg0: i32) -> (i32, i32) {
    %c0_i32 = arith.constant 0 : i32
    %c0_i32_0 = arith.constant 0 : i32
    %c0_i32_1 = arith.constant 0 : i32
    return %c0_i32, %c0_i32_0 : i32, i32
  }
  func.func @transform_7(%arg0: i32) -> (i32, i32) {
    %c0_i32 = arith.constant 0 : i32
    %c0_i32_0 = arith.constant 0 : i32
    %c0_i32_1 = arith.constant 0 : i32
    return %c0_i32, %c0_i32_0 : i32, i32
  }
  func.func @transform_8(%arg0: i32) -> (i32, i32) {
    %c0_i32 = arith.constant 0 : i32
    %c0_i32_0 = arith.constant 0 : i32
    %c0_i32_1 = arith.constant 0 : i32
    return %c0_i32, %c0_i32_0 : i32, i32
  }
  func.func @transform_9(%arg0: i32) -> (i32, i32) {
    %c0_i32 = arith.constant 0 : i32
    %c0_i32_0 = arith.constant 0 : i32
    %c0_i32_1 = arith.constant 0 : i32
    return %c0_i32, %c0_i32_0 : i32, i32
  }
  func.func @transform_10(%arg0: i32) -> (i32, i32) {
    %c0_i32 = arith.constant 0 : i32
    %c0_i32_0 = arith.constant 0 : i32
    %c0_i32_1 = arith.constant 0 : i32
    return %c0_i32, %c0_i32_0 : i32, i32
  }
  func.func @transform_11(%arg0: i32) -> (i32, i32) {
    %c0_i32 = arith.constant 0 : i32
    %c0_i32_0 = arith.constant 0 : i32
    %c0_i32_1 = arith.constant 0 : i32
    return %c0_i32, %c0_i32_0 : i32, i32
  }
  func.func @transform_12(%arg0: i32) -> (i32, i32, i32) {
    %c0_i32 = arith.constant 0 : i32
    %c0_i32_0 = arith.constant 0 : i32
    %c0_i32_1 = arith.constant 0 : i32
    return %arg0, %c0_i32, %c0_i32_0 : i32, i32, i32
  }
}

</mosaic_0001>

<bundles_post_ra>
// kernel: tpu_custom_call.1
= control target key start
LH: loop header
LB: loop body
LE: loop exit
PB: predicated region body
PF: predicated region fallthrough
CT: control target
= control target key end

     0   :  { %s5876_s0 = inlined_call_operand.hbm [shape: f32[8,8,128], index: 0, kind: input, shape index: {}]   ;;  %s5877_s1 = inlined_call_operand.vmem [shape: f32[1,128], index: 1, kind: input, shape index: {}]   ;;  %s5878_s2 = inlined_call_operand.vmem [shape: f32[1,128], index: 2, kind: input, shape index: {}]   ;;  %s5879_s3 = inlined_call_operand.hbm [shape: bf16[128,384], index: 3, kind: input, shape index: {}]   ;;  %s5880_s4 = inlined_call_operand.hbm [shape: bf16[128,128], index: 4, kind: input, shape index: {}]   ;;  %s5881_s5 = inlined_call_operand.vmem [shape: f32[1,128], index: 5, kind: input, shape index: {}]   ;;  %s5882_s6 = inlined_call_operand.vmem [shape: f32[1,128], index: 6, kind: input, shape index: {}]   ;;  %s5883_s7 = inlined_call_operand.vmem [shape: f32[1,128], index: 7, kind: input, shape index: {}]   ;;  %s5884_s8 = inlined_call_operand.hbm [shape: bf16[128,512], index: 8, kind: input, shape index: {}]   ;;  %s5885_s9 = inlined_call_operand.vmem [shape: f32[1,512], index: 9, kind: input, shape index: {}]   ;;  %s5886_s10 = inlined_call_operand.hbm [shape: bf16[512,128], index: 10, kind: input, shape index: {}]   ;;  %s5887_s11 = inlined_call_operand.vmem [shape: f32[1,128], index: 11, kind: input, shape index: {}]   ;;  %s5888_s12 = inlined_call_operand.hbm [shape: f32[8,8,128], index: 12, kind: output, shape index: {}]  }
   0x1   :  { %5895 = sst [smem:[#allocation18_spill]] %s5879_s3 }
   0x2   :  { %5896 = sst [smem:[#allocation19_spill]] %s5885_s9 }
   0x3   :  { %5897 = sst [smem:[#allocation20_spill]] %s5887_s11 }
   0x4   :  { %5898 = sst [smem:[#allocation21_spill]] %s5888_s12 }
   0x5   :  { %17 = vsyncpa [#allocation3], 0 }
   0x6   :  { %19 = vsyncpa [#allocation3 + $0x1], 0 }
   0x7   :  { %20 = vsyncpa [#allocation6], 0 }
   0x8   :  { %21 = vsyncpa [#allocation9], 0 }
   0x9   :  { %22 = vsyncpa [#allocation4], 0 }
   0xa   :  { %24 = vsyncpa [#allocation4 + $0x1], 0  ;;  %s5021_s21 = smov 0   ;;  %s5023_s22 = smov 0  }
   0xb   :  { %s5025_s23 = smov 0   ;;  %s5027_s24 = smov 0  }
   0xc LB: > { %5899 = sst [smem:[#allocation16_spill]] %s4920_s21  ;;  %s5042_s25 = sadd.s32 4294967295, %s4932_s24   ;;  %s4932_s24 = sphi %s5027_s24, %s5926_s24   ;;  %s4928_s23 = sphi %s5025_s23, %s5925_s23   ;;  %s4924_s22 = sphi %s5023_s22, %s5924_s22   ;;  %s4920_s21 = sphi %s5021_s21, %s5923_s21  }
   0xd   : > { %s3817_s26 = sadd.s32 4294967294, %s4932_s24   ;;  %p50_p0 = scmp.ne.s32.totalorder %s4924_s22, %s4920_s21 }
   0xe   : > { %p5890_p1 = scmp.eq.s32.totalorder %s5042_s25, 0  ;;  %p311_p3 = scmp.eq.s32.totalorder %s3817_s26, 1 }
   0xf   : > { %p3818_p5 = scmp.ge.s32.totalorder %s4932_s24, 1  ;;  %p318_p7 = scmp.lt.s32.totalorder %s4932_s24, 3 }
  0x10   : > { %p5051_p4 = por %p5890_p1, %p50_p0  ;;  %p5056_p6 = por %p311_p3, %p50_p0 }
  0x11   : > { %p5061_p8 = pnand %p3818_p5, %p318_p7  ;;  %s4934_s30 = smov [#allocation5]  }
  0x12   : > { %s5900_s27 = scalar_select %p5051_p4, 1, 0 }
  0x13   : > { %s5901_s28 = scalar_select %p5056_p6, 1, 0 }
  0x14   : > { %s5903_s29 = scalar_select %p5061_p8, 1, 0 }
  0x15   : > { %5902 = sst [smem:[#allocation17_spill]] %s5901_s28  ;;  %s336_s13 = sshll.u32 %s4934_s30, 4  ;;  %s5065_s13 = int_to_ptr.vmem [resolvable:$true] %s336_s13 }
  0x16   : > { %p4367_p9 = pneg %p5061_p8  ;;  %s4935_s15 = smov [#allocation8]  }
  0x17   : > { %s371_s16 = sshll.u32 %s4935_s15, 4  ;;  %s5905_s3 = sld [smem:[#allocation18_spill]]  ;;  %s5076_s16 = int_to_ptr.vmem [resolvable:$true] %s371_s16 }
  0x18   : > { %p5072_p11 = pnand %p4367_p9, %p5890_p1 }
  0x1a   : > { %p5086_p13 = pneg %p5072_p11 }
  0x1d   : > { %s4716_s19 = scalar_lea.hbm %s5905_s3, 3072 }
  0x1e   : > { %p4717_p12 = scmp.ne.s32.totalorder %s5905_s3, %s4716_s19  ;;  %p4723_p5 = scmp.lt.u32.totalorder %s4716_s19, %s5905_s3 }
  0x20   : > { %p4719_p0 = pnand %p5086_p13, %p4717_p12 }
  0x22   : > { %p4720_p3 = pneg %p4719_p0 }
  0x24   : > { %p4725_p7 = pnand %p4723_p5, %p4720_p3 }
  0x26   : > { %4728 = shalt.err (!%p4725_p7)
}
  0x27   : > { %s4729_s17 = scalar_lea.vmem %s5065_s13, 3072  ;;  %p4737_p2 = scmp.lt.s32.totalorder %s5065_s13, %s5065_s13 }
  0x28   : > { %p4730_p9 = scmp.ne.s32.totalorder %s5065_s13, %s4729_s17  ;;  %p4738_p6 = scmp.lt.s32.totalorder %s4729_s17, %s4729_s17 }
  0x2a   : > { %p4732_p10 = pnand %p4730_p9, %p5086_p13  ;;  %p4739_p12 = por %p4738_p6, %p4737_p2 }
  0x2c   : > { %p4733_p1 = pneg %p4732_p10 }
  0x2e   : > { %p4740_p0 = pnand %p4739_p12, %p4733_p1 }
  0x30   : > { %4743 = shalt.err (!%p4740_p0)
}
  0x31   : > { %s4936_s18 = smov 192   ;;  %s4937_s28 = smov 12  }
  0x32   : > { %4370 = dma.hbm_to_vmem [thread:$0]  (!%p5072_p11), %s5905_s3, 3072, %s5065_s13, [#allocation6], %s4936_s18, %s4936_s18, %s4937_s28  }
  0x33   : > { %s4744_s21 = scalar_lea.hbm %s5884_s8, 4096 }
  0x34   : > { %p4745_p2 = scmp.ne.s32.totalorder %s5884_s8, %s4744_s21  ;;  %p4751_p10 = scmp.lt.u32.totalorder %s4744_s21, %s5884_s8 }
  0x36   : > { %p4747_p1 = pnand %p4745_p2, %p5086_p13 }
  0x38   : > { %p4748_p6 = pneg %p4747_p1 }
  0x3a   : > { %p4753_p3 = pnand %p4751_p10, %p4748_p6 }
  0x3c   : > { %4756 = shalt.err (!%p4753_p3)
}
  0x3d   : > { %s4757_s13 = scalar_lea.vmem %s5076_s16, 4096  ;;  %p4765_p12 = scmp.lt.s32.totalorder %s5076_s16, %s5076_s16 }
  0x3e   : > { %p4758_p5 = scmp.ne.s32.totalorder %s5076_s16, %s4757_s13  ;;  %p4766_p0 = scmp.lt.s32.totalorder %s4757_s13, %s4757_s13 }
  0x40   : > { %p4760_p7 = pnand %p4758_p5, %p5086_p13  ;;  %p4767_p2 = por %p4766_p0, %p4765_p12 }
  0x42   : > { %p4761_p9 = pneg %p4760_p7 }
  0x44   : > { %p4768_p1 = pnand %p4767_p2, %p4761_p9 }
  0x46   : > { %4771 = shalt.err (!%p4768_p1)
}
  0x47   : > { %s4938_s11 = smov 256   ;;  %s4939_s9 = smov 16  }
  0x48   : > { %4376 = dma.hbm_to_vmem [thread:$0]  (!%p5072_p11), %s5884_s8, 4096, %s5076_s16, [#allocation9], %s4938_s11, %s4938_s11, %s4939_s9  }
  0x49   : > { %s4940_s18 = smov [#allocation7]   ;;  %s4772_s26 = scalar_lea.hbm %s5880_s4, 1024 }
  0x4a   : > { %s349_s28 = sshll.u32 %s4940_s18, 4  ;;  %p4773_p6 = scmp.ne.s32.totalorder %s5880_s4, %s4772_s26  ;;  %s350_s28 = int_to_ptr.vmem [resolvable:$true] %s349_s28 }
  0x4b   : > { %p4779_p5 = scmp.lt.u32.totalorder %s4772_s26, %s5880_s4 }
  0x4c   : > { %p4775_p10 = pnand %p4773_p6, %p5086_p13 }
  0x4e   : > { %p4776_p3 = pneg %p4775_p10 }
  0x50   : > { %p4781_p7 = pnand %p4779_p5, %p4776_p3 }
  0x52   : > { %4784 = shalt.err (!%p4781_p7)
}
  0x53   : > { %s4785_s16 = scalar_lea.vmem %s350_s28, 1024  ;;  %p4793_p2 = scmp.lt.s32.totalorder %s350_s28, %s350_s28 }
  0x54   : > { %p4786_p9 = scmp.ne.s32.totalorder %s350_s28, %s4785_s16  ;;  %p4794_p1 = scmp.lt.s32.totalorder %s4785_s16, %s4785_s16 }
  0x56   : > { %p4788_p12 = pnand %p4786_p9, %p5086_p13  ;;  %p4795_p4 = por %p4794_p1, %p4793_p2 }
  0x58   : > { %p4789_p0 = pneg %p4788_p12 }
  0x5a   : > { %p4796_p8 = pnand %p4795_p4, %p4789_p0 }
  0x5c   : > { %4799 = shalt.err (!%p4796_p8)
}
  0x5d   : > { %s4941_s11 = smov 64   ;;  %s4942_s9 = smov 4  }
  0x5e   : > { %4373 = dma.hbm_to_vmem [thread:$0]  (!%p5072_p11), %s5880_s4, 1024, %s350_s28, [#allocation6], %s4941_s11, %s4941_s11, %s4942_s9  }
  0x5f   : > { %s4943_s21 = smov [#allocation10]   ;;  %s4800_s26 = scalar_lea.hbm %s5886_s10, 4096 }
  0x60   : > { %s387_s18 = sshll.u32 %s4943_s21, 4  ;;  %p4801_p4 = scmp.ne.s32.totalorder %s5886_s10, %s4800_s26  ;;  %s388_s18 = int_to_ptr.vmem [resolvable:$true] %s387_s18 }
  0x61   : > { %p4807_p10 = scmp.lt.u32.totalorder %s4800_s26, %s5886_s10 }
  0x62   : > { %p4803_p8 = pnand %p4801_p4, %p5086_p13 }
  0x64   : > { %p4804_p6 = pneg %p4803_p8 }
  0x66   : > { %p4809_p3 = pnand %p4807_p10, %p4804_p6 }
  0x68   : > { %4812 = shalt.err (!%p4809_p3)
}
  0x69   : > { %s4813_s28 = scalar_lea.vmem %s388_s18, 4096  ;;  %p4821_p12 = scmp.lt.s32.totalorder %s388_s18, %s388_s18 }
  0x6a   : > { %p4814_p5 = scmp.ne.s32.totalorder %s388_s18, %s4813_s28  ;;  %p4822_p0 = scmp.lt.s32.totalorder %s4813_s28, %s4813_s28 }
  0x6c   : > { %p4816_p7 = pnand %p4814_p5, %p5086_p13  ;;  %p4823_p2 = por %p4822_p0, %p4821_p12 }
  0x6e   : > { %p4817_p9 = pneg %p4816_p7 }
  0x70   : > { %p4824_p1 = pnand %p4823_p2, %p4817_p9 }
  0x72   : > { %4827 = shalt.err (!%p4824_p1)
}
  0x73   : > { %4379 = dma.hbm_to_vmem [thread:$0]  (!%p5072_p11), %s5886_s10, 4096, %s388_s18, [#allocation9], %s4941_s11, %s4941_s11, %s4942_s9  }
  0x74   : > { %s5167_s30 = sadd.s32 1, %s4932_s24   ;;  %s37_s21 = sadd.s32 1, %s4928_s23 }
  0x75   : > { %s34_s14 = ssub.s32 %s4932_s24, %s5167_s30  ;;  %p44_p13 = scmp.ne.s32.totalorder %s4928_s23, %s4924_s22 }
  0x76   : > { %p35_p4 = scmp.eq.s32.totalorder %s34_s14, 0  ;;  %p45_p8 = scmp.eq.s32.totalorder %s4932_s24, 0 }
  0x77   : > { %p5907_p6 = scmp.eq.s32.totalorder %s5042_s25, 1  ;;  %p4392_p3 = scmp.lt.s32.totalorder %s4932_s24, 2 }
  0x78   : > { %s5183_s20 = scalar_select %p35_p4, %s4928_s23, %s37_s21  }
  0x79   : > { %p5177_p10 = por %p5907_p6, %p44_p13  ;;  %p46_p5 = por %p45_p8, %p44_p13 }
  0x7a   : > { %s404_s26 = sand.u32 1, %s4928_s23   ;;  %s3973_s11 = sshll.u32 %s4932_s24, 9 }
  0x7b   : > { %s3824_s15 = sshll.u32 %s404_s26, 5  ;;  %s5190_s17 = scalar_lea.hbm %s5876_s0, %s3973_s11 }
  0x7c   : > { %s408_s13 = scalar_lea.vmem [#allocation2], %s3824_s15  ;;  %p5194_p11 = pnand %p4392_p3, %p46_p5 }
  0x7d   : > { %s415_s16 = sshll.u32 %s408_s13, 4  ;;  %s5198_s3 = scalar_lea.sflag [#allocation3], %s404_s26  ;;  %s5192_s16 = int_to_ptr.vmem [resolvable:$true] %s415_s16 }
  0x7e   : > { %s4828_s12 = scalar_lea.hbm %s5190_s17, 512  ;;  %p4830_p9 = pneg %p5194_p11 }
  0x7f   : > { %p4829_p7 = scmp.ne.s32.totalorder %s5190_s17, %s4828_s12  ;;  %s4833_s15 = scalar_lea.hbm %s5876_s0, 1024 }
  0x80   : > { %p4834_p2 = scmp.lt.u32.totalorder %s5190_s17, %s5876_s0  ;;  %p4835_p1 = scmp.lt.u32.totalorder %s4833_s15, %s4828_s12 }
  0x81   : > { %p4831_p12 = pnand %p4830_p9, %p4829_p7  ;;  %p4837_p4 = scmp.lt.u32.totalorder %s4828_s12, %s5190_s17 }
  0x82   : > { %p4836_p13 = por %p4835_p1, %p4834_p2 }
  0x83   : > { %p4832_p0 = pneg %p4831_p12 }
  0x84   : > { %p4838_p8 = por %p4837_p4, %p4836_p13 }
  0x86   : > { %p4839_p6 = pnand %p4838_p8, %p4832_p0 }
  0x88   : > { %4842 = shalt.err (!%p4839_p6)
}
  0x89   : > { %s4843_s26 = scalar_lea.vmem %s5192_s16, 512  ;;  %s4944_s18 = smov [#allocation2]  }
  0x8a   : > { %p4844_p3 = scmp.ne.s32.totalorder %s5192_s16, %s4843_s26  ;;  %s4848_s13 = sshll.u32 %s4944_s18, 4  ;;  %s4849_s13 = int_to_ptr.vmem [resolvable:$false] %s4848_s13 }
  0x8b   : > { %s4850_s21 = scalar_lea.vmem %s4849_s13, 1024  ;;  %p4851_p12 = scmp.lt.s32.totalorder %s5192_s16, %s4849_s13 }
  0x8c   : > { %p4846_p5 = pnand %p4844_p3, %p4830_p9  ;;  %p4852_p2 = scmp.lt.s32.totalorder %s4850_s21, %s4843_s26 }
  0x8e   : > { %p4847_p7 = pneg %p4846_p5  ;;  %p4853_p1 = por %p4852_p2, %p4851_p12 }
  0x90   : > { %p4854_p13 = pnand %p4853_p1, %p4847_p7 }
  0x92   : > { %4857 = shalt.err (!%p4854_p13)
}
  0x93   : > { %s4945_s12 = smov 128   ;;  %s4946_s14 = smov 8  }
  0x94   : > { %4383 = dma.hbm_to_vmem [thread:$0]  (!%p5194_p11), %s5190_s17, 512, %s5192_s16, %s5198_s3, %s4945_s12, %s4945_s12, %s4946_s14  }
  0x95   : > { %p5910_p9 = scmp.ne.s32.totalorder %s5903_s29, 0 }
  0x96   : > { %s5229_s15 = sand.u32 (!%p5910_p9), 1, %s4924_s22   ;;  %p5911_p0 = scmp.ne.s32.totalorder (!%p5910_p9), %s5900_s27, 0 }
  0x97   : > { %427 = sbr.rel (%p5910_p9) target bundleno = 4437 (0x1155), region = 68  ;;  %s3828_s11 = sshll.u32 (!%p5910_p9), %s5229_s15, 5 }
  0x98   : > { %s430_s9 = scalar_lea.sflag (!%p5910_p9), [#allocation3], %s5229_s15  ;;  %s5235_s26 = scalar_lea.vmem (!%p5910_p9), [#allocation2], %s3828_s11 }
  0x9e   : > { %4903 = dma.done.wait (%p5911_p0), %s430_s9, 512  }
  0x9f   : > { %4905 = vsyncadd (%p5911_p0), %s430_s9, 4294966784  ;;  %p5912_p11 = scmp.eq.s32.totalorder %s5042_s25, 0 }
  0xa1   : > { %4907 = dma.done.wait (%p5912_p11), [#allocation6], 4096   ;;  %p5913_p4 = pmov %p5912_p11 }
  0xa3   : > { %4909 = vsyncadd (%p5913_p4), [#allocation6], 4294963200  ;;  %p5914_p8 = pmov %p5913_p4 }
  0xa4   : > { %p5915_p6 = pmov %p5913_p4 }
  0xa5   : > { %4911 = dma.done.wait (%p5914_p8), [#allocation9], 8192  }
  0xa6   : > { %4913 = vsyncadd (%p5915_p6), [#allocation9], 4294959104  ;;  %v493_v0 = vld [vmem:[%s5235_s26] sm:$0xff]  ;;  %v495_v1 = vld [vmem:[%s5235_s26 + $0x10] sm:$0xff]  ;;  %v4947_v39 = vmov 0   ;;  %vm4949_vm0 = vmmov 0  }
  0xa7   : > { %v494_v2 = vld [vmem:[%s5235_s26 + $0x8] sm:$0xff]  ;;  %499 = vadd.xlane.f32.xlu0 %v493_v0  ;;  %503 = vadd.xlane.f32.xlu1 %v495_v1  ;;  %v496_v3 = vld [vmem:[%s5235_s26 + $0x18] sm:$0xff]  ;;  %v4480_v4 = vld [vmem:[#allocation5 + $0x4] ss:$12 sps:$4 sm:$0xff]   ;;  %vm844_vm1 = vcmask 261120   ;;  %vm1081_vm2 = vcmask 1043456  }
  0xa8   : > { %v4482_v5 = vld [vmem:[#allocation5] ss:$12 sps:$4 sm:$0xff]   ;;  %v4483_v6 = vld [vmem:[#allocation5 + $0x1c] ss:$12 sps:$4 sm:$0xff]   ;;  %726 = vmatprep.subr.bf16.mxu0 %v4480_v4  ;;  %v4486_v24 = vld [vmem:[#allocation5 + $0x18] ss:$12 sps:$4 sm:$0xff]   ;;  %758 = vmatprep.mubr.bf16.mxu0 %v4947_v39 }
  0xa9   : > { %v4485_v7 = vld [vmem:[#allocation5 + $0x8] ss:$12 sps:$4 sm:$0xff]   ;;  %727 = vmatpush1.bf16.msra.mxu0 %v4482_v5  ;;  %v4489_v26 = vld [vmem:[#allocation5 + $0x20] ss:$12 sps:$4 sm:$0xff]   ;;  %v4490_v27 = vld [vmem:[#allocation5 + $0x30] ss:$12 sps:$4 sm:$0xff]  }
  0xaa   : > { %4115 = vmatprep.subr.bf16.mxu1 %v4485_v7  ;;  %728 = vmatprep.subr.bf16.mxu0 %v4483_v6  ;;  %v4487_v25 = vld [vmem:[#allocation5 + $0x34] ss:$12 sps:$4 sm:$0xff]   ;;  %v4491_v28 = vld [vmem:[#allocation5 + $0x4c] ss:$12 sps:$4 sm:$0xff]   ;;  %v4495_v31 = vld [vmem:[#allocation5 + $0x64] ss:$12 sps:$4 sm:$0xff]  }
  0xab   : > { %501 = vadd.xlane.f32.xlu0 %v494_v2  ;;  %505 = vadd.xlane.f32.xlu1 %v496_v3  ;;  %v4493_v29 = vld [vmem:[#allocation5 + $0x38] ss:$12 sps:$4 sm:$0xff]   ;;  %v4494_v30 = vld [vmem:[#allocation5 + $0x48] ss:$12 sps:$4 sm:$0xff]   ;;  %v4497_v32 = vld [vmem:[#allocation5 + $0x50] ss:$12 sps:$4 sm:$0xff]  }
  0xac   : > { %4116 = vmatpush3.bf16.msra.mxu1 %v4485_v7  ;;  %v4498_v33 = vld [vmem:[#allocation5 + $0x60] ss:$12 sps:$4 sm:$0xff]   ;;  %v4499_v34 = vld [vmem:[#allocation5 + $0x7c] ss:$12 sps:$4 sm:$0xff]   ;;  %v4502_v36 = vld [vmem:[#allocation5 + $0x78] ss:$12 sps:$4 sm:$0xff]  }
  0xad   : > { %729 = vmatpush1.bf16.msra.mxu0 %v4486_v24  ;;  %4117 = vmatprep.subr.bf16.mxu1 %v4489_v26  ;;  %v4501_v35 = vld [vmem:[#allocation5 + $0x68] ss:$12 sps:$4 sm:$0xff]   ;;  %v4505_v38 = vld [vmem:[#allocation5 + $0x80] ss:$12 sps:$4 sm:$0xff]   ;;  %v4506_v40 = vld [vmem:[#allocation5 + $0x90] ss:$12 sps:$4 sm:$0xff]  }
  0xae   : > { %730 = vmatprep.subr.bf16.mxu0 %v4487_v25  ;;  %v4503_v37 = vld [vmem:[#allocation5 + $0x94] ss:$12 sps:$4 sm:$0xff]   ;;  %v4507_v41 = vld [vmem:[#allocation5 + $0xac] ss:$12 sps:$4 sm:$0xff]   ;;  %v4511_v44 = vld [vmem:[#allocation5 + $0xb0] ss:$12 sps:$4 sm:$0xff]  }
  0xaf   : > { %v4509_v42 = vld [vmem:[#allocation5 + $0x98] ss:$12 sps:$4 sm:$0xff]   ;;  %v4510_v43 = vld [vmem:[#allocation5 + $0xa8] ss:$12 sps:$4 sm:$0xff]   ;;  %v3834_v59 = vld [vmem:[%s5877_s1] ss:$0 sm:$0xff] }
  0xb0   : > { %4118 = vmatpush3.bf16.msra.mxu1 %v4489_v26  ;;  %vm1029_vm3 = vcmask 64512   ;;  %s4950_s28 = smov 96   ;;  %s4951_s3 = smov 64   ;;  %vm2647_vm4 = vcmask 523264   ;;  %vm2652_vm5 = vcmask 785408  }
  0xb1   : > { %731 = vmatpush1.bf16.msra.mxu0 %v4490_v27  ;;  %4119 = vmatprep.subr.bf16.mxu1 %v4493_v29  ;;  %s4952_s18 = smov 32   ;;  %s5916_s17 = sld [smem:[#allocation19_spill]] }
  0xb2   : > { %732 = vmatprep.subr.bf16.mxu0 %v4491_v28  ;;  %s5918_s14 = sld [smem:[#allocation21_spill]] }
  0xb4   : > { %4120 = vmatpush3.bf16.msra.mxu1 %v4493_v29 }
  0xb5   : > { %733 = vmatpush1.bf16.msra.mxu0 %v4494_v30  ;;  %4121 = vmatprep.subr.bf16.mxu1 %v4497_v32 }
  0xb6   : > { %734 = vmatprep.subr.bf16.mxu0 %v4495_v31 }
  0xb8   : > { %4122 = vmatpush3.bf16.msra.mxu1 %v4497_v32 }
  0xb9   : > { %735 = vmatpush1.bf16.msra.mxu0 %v4498_v33  ;;  %4123 = vmatprep.subr.bf16.mxu1 %v4501_v35 }
  0xba   : > { %736 = vmatprep.subr.bf16.mxu0 %v4499_v34 }
  0xbc   : > { %4124 = vmatpush3.bf16.msra.mxu1 %v4501_v35 }
  0xbd   : > { %737 = vmatpush1.bf16.msra.mxu0 %v4502_v36  ;;  %4125 = vmatprep.subr.bf16.mxu1 %v4505_v38 }
  0xbe   : > { %738 = vmatprep.subr.bf16.mxu0 %v4503_v37 }
  0xc0   : > { %4126 = vmatpush3.bf16.msra.mxu1 %v4505_v38 }
  0xc1   : > { %739 = vmatpush1.bf16.msra.mxu0 %v4506_v40  ;;  %4127 = vmatprep.subr.bf16.mxu1 %v4509_v42 }
  0xc2   : > { %740 = vmatprep.subr.bf16.mxu0 %v4507_v41 }
  0xc4   : > { %4128 = vmatpush3.bf16.msra.mxu1 %v4509_v42 }
  0xc5   : > { %741 = vmatpush1.bf16.msra.mxu0 %v4510_v43  ;;  %4129 = vmatprep.subr.bf16.mxu1 %v4511_v44 }
  0xc8   : > { %4130 = vmatpush3.bf16.msra.mxu1 %v4511_v44 }
 0x134   : > { %v500_v8 = vpop.xlane.xlu0 %499  ;;  %v504_v9 = vpop.xlane.xlu1 %503 }
 0x135   : > { %v508_v10 = vmul.f32 0.0078125, %v500_v8  ;;  %v510_v11 = vmul.f32 0.0078125, %v504_v9 }
 0x137   : > { %v5253_v12 = vsub.f32 %v493_v0, %v508_v10  ;;  %v5255_v13 = vsub.f32 %v495_v1, %v510_v11  ;;  %v3835_v0 = vld [vmem:[%s5878_s2] ss:$0 sm:$0xff] }
 0x138   : > { %v502_v14 = vpop.xlane.xlu0 %501  ;;  %v506_v15 = vpop.xlane.xlu1 %505 }
 0x139   : > { %v509_v16 = vmul.f32 0.0078125, %v502_v14  ;;  %v516_v17 = vmul.f32 %v5253_v12, %v5253_v12  ;;  %v511_v18 = vmul.f32 0.0078125, %v506_v15  ;;  %v518_v21 = vmul.f32 %v5255_v13, %v5255_v13 }
 0x13a   : > { %v4948_v14 = vmov 0.0  }
 0x13b   : > { %v5259_v19 = vsub.f32 %v494_v2, %v509_v16  ;;  %520 = vadd.xlane.f32.xlu0 %v516_v17  ;;  %v5261_v20 = vsub.f32 %v496_v3, %v511_v18  ;;  %4135 = vmatprep.subr.bf16.mxu0 %v4948_v14 }
 0x13c   : > { %4147 = vmatprep.subr.bf16.mxu1 %v4948_v14 }
 0x13d   : > { %v517_v22 = vmul.f32 %v5259_v19, %v5259_v19  ;;  %v519_v23 = vmul.f32 %v5261_v20, %v5261_v20 }
 0x13f   : > { %524 = vadd.xlane.f32.xlu0 %v518_v21  ;;  %522 = vadd.xlane.f32.xlu1 %v517_v22 }
 0x143   : > { %526 = vadd.xlane.f32.xlu1 %v519_v23 }
 0x1c8   : > { %v521_v45 = vpop.xlane.xlu0 %520 }
 0x1c9   : > { %v528_v46 = vmul.f32 0.0078125, %v521_v45 }
 0x1cb   : > { %v532_v47 = vadd.f32 1e-05, %v528_v46 }
 0x1cc   : > { %v523_v48 = vpop.xlane.xlu1 %522  ;;  %v525_v49 = vpop.xlane.xlu0 %524 }
 0x1cd   : > { %4600 = vrsqrt.f32 %v532_v47  ;;  %v529_v50 = vmul.f32 0.0078125, %v523_v48  ;;  %v530_v51 = vmul.f32 0.0078125, %v525_v49 }
 0x1cf   : > { %v533_v52 = vadd.f32 1e-05, %v529_v50  ;;  %v534_v53 = vadd.f32 1e-05, %v530_v51 }
 0x1d0   : > { %v527_v54 = vpop.xlane.xlu1 %526 }
 0x1d1   : > { %4602 = vrsqrt.f32 %v533_v52  ;;  %v531_v55 = vmul.f32 0.0078125, %v527_v54 }
 0x1d2   : > { %4604 = vrsqrt.f32 %v534_v53 }
 0x1d3   : > { %v535_v56 = vadd.f32 1e-05, %v531_v55 }
 0x1d5   : > { %4606 = vrsqrt.f32 %v535_v56 }
 0x1d7   : > { %v4601_v57 = vpop.eup %4600 }
 0x1d8   : > { %v540_v58 = vmul.f32 %v4601_v57, %v5253_v12 }
 0x1da   : > { %v550_v63 = vmul.f32 %v3834_v59, %v540_v58 }
 0x1db   : > { %v4603_v60 = vpop.eup %4602 }
 0x1dc   : > { %v4605_v61 = vpop.eup %4604  ;;  %v541_v62 = vmul.f32 %v4603_v60, %v5259_v19  ;;  %v560_v4 = vadd.f32 %v3835_v0, %v550_v63 }
 0x1dd   : > { %v542_v1 = vmul.f32 %v4605_v61, %v5255_v13 }
 0x1de   : > { %v551_v2 = vmul.f32 %v3834_v59, %v541_v62 }
 0x1df   : > { %v4607_v3 = vpop.eup %4606  ;;  %v552_v7 = vmul.f32 %v3834_v59, %v542_v1 }
 0x1e0   : > { %v561_v5 = vadd.f32 %v3835_v0, %v551_v2  ;;  %v543_v6 = vmul.f32 %v4607_v3, %v5261_v20 }
 0x1e1   : > { %v562_v10 = vadd.f32 %v3835_v0, %v552_v7 }
 0x1e2   : > { %v564_v8 = vpack.c.bf16 %v561_v5, %v560_v4  ;;  %v553_v9 = vmul.f32 %v3834_v59, %v543_v6 }
 0x1e4   : > { %759 = vmatmul.mubr.bf16.vlgmr.msra.gmra.mrb[0].mxu0 %v564_v8  ;;  %4131 = vmatprep.mubr.bf16.mxu1 %v564_v8  ;;  %v563_v11 = vadd.f32 %v3835_v0, %v553_v9 }
 0x1e5   : > { %768 = vmatprep.mubr.bf16.mxu0 %v4947_v39 }
 0x1e6   : > { %v565_v12 = vpack.c.bf16 %v563_v11, %v562_v10 }
 0x1e8   : > { %4132 = vmatmul.mubr.bf16.vlgmr.msra.gmra.mrb[0].mxu1 %v565_v12 }
 0x1e9   : > { %4149 = vmatprep.mubr.msk.bf16.mxu1 %vm4949_vm0, %v4948_v14 }
 0x1ec   : > { %769 = vmatmul.mubr.bf16.gmra.mrb[4].mxu0 %v565_v12 }
 0x1ed   : > { %4137 = vmatprep.mubr.msk.bf16.mxu0 %vm4949_vm0, %v4948_v14 }
 0x2b7   : > { %v760_v13 = vpop.f32.mrb[0].mxu0 }
 0x2b8   : > { %v762_v15 = vpop.f32.mrb[1].mxu0  ;;  %v828_v22 = vmul.f32 0.17677669, %v760_v13 }
 0x2b9   : > { %v5287_v16 = vpack.c.bf16 %v762_v15, %v762_v15  ;;  %v764_v17 = vpop.f32.mrb[2].mxu0 }
 0x2ba   : > { %v766_v18 = vpop.f32.mrb[3].mxu0  ;;  %v5298_v28 = vpack.c.bf16 %v828_v22, %v828_v22  ;;  %v829_v34 = vmul.f32 0.17677669, %v764_v17 }
 0x2bb   : > { %v5289_v19 = vpop.f32.mrb[0].mxu1  ;;  %v849_v20 = vsel %vm844_vm1, %v5287_v16, 0  ;;  %v5296_v25 = vpack.c.bf16 %v766_v18, %v766_v18 }
 0x2bc   : > { %v813_v21 = vpop.f32.mrb[1].mxu1  ;;  %4136 = vmatpush3.bf16.xpose.msra.mxu0 %v849_v20  ;;  %v5316_v38 = vpack.c.bf16 %v829_v34, %v829_v34  ;;  %v5371_v34 = vpack.c.bf16 %v5289_v19, %v5289_v19 }
 0x2bd   : > { %v5293_v23 = vpop.f32.mrb[2].mxu1  ;;  %4141 = vmatprep.subr.bf16.mxu0 %v4948_v14  ;;  %v895_v32 = vsel %vm844_vm1, %v5296_v25, 0  ;;  %v5312_v36 = vpack.c.bf16 %v813_v21, %v813_v21 }
 0x2be   : > { %v816_v24 = vpop.f32.mrb[3].mxu1  ;;  %v5381_v19 = vpack.c.bf16 %v5293_v23, %v5293_v23 }
 0x2bf   : > { %v770_v26 = vpop.f32.mrb[4].mxu0  ;;  %v1083_v42 = vsel %vm1081_vm2, %v5312_v36, 0  ;;  %v5334_v44 = vpack.c.bf16 %v816_v24, %v816_v24 }
 0x2c0   : > { %v772_v27 = vpop.f32.mrb[5].mxu0  ;;  %v830_v35 = vmul.f32 0.17677669, %v770_v26 }
 0x2c1   : > { %v5300_v29 = vpack.c.bf16 %v772_v27, %v772_v27  ;;  %v774_v30 = vpop.f32.mrb[6].mxu0  ;;  %v1129_v46 = vsel %vm1081_vm2, %v5334_v44, 0 }
 0x2c2   : > { %v776_v31 = vpop.f32.mrb[7].mxu0  ;;  %v5318_v40 = vpack.c.bf16 %v830_v35, %v830_v35  ;;  %v831_v43 = vmul.f32 0.17677669, %v774_v30 }
 0x2c3   : > { %4138 = vmatmul.mubr.msk.bf16.vlgmr.msra.gmra.mrb[8].mxu0 %vm844_vm1, %v5298_v28  ;;  %v941_v33 = vsel %vm844_vm1, %v5300_v29, 0  ;;  %v5314_v37 = vpack.c.bf16 %v776_v31, %v776_v31 }
 0x2c4   : > { %4142 = vmatpush3.bf16.xpose.msra.mxu0 %v895_v32  ;;  %4148 = vmatpush3.bf16.xpose.msra.mxu1 %v941_v33  ;;  %v5336_v45 = vpack.c.bf16 %v831_v43, %v831_v43 }
 0x2c5   : > { %4143 = vmatprep.mubr.msk.bf16.mxu0 %vm4949_vm0, %v4948_v14  ;;  %4153 = vmatprep.subr.bf16.mxu0 %v4948_v14  ;;  %v987_v41 = vsel %vm844_vm1, %v5314_v37, 0 }
 0x2c6   : > { %4159 = vmatprep.subr.bf16.mxu1 %v4948_v14 }
 0x2cb   : > { %4144 = vmatmul.mubr.msk.bf16.vlgmr.msra.gmra.mrb[12].mxu0 %vm844_vm1, %v5316_v38  ;;  %4150 = vmatmul.mubr.msk.bf16.vlgmr.msra.gmra.mrb[4].mxu1 %vm844_vm1, %v5318_v40 }
 0x2cc   : > { %4154 = vmatpush3.bf16.xpose.msra.mxu0 %v987_v41  ;;  %4160 = vmatpush3.bf16.msra.mxu1 %v1083_v42  ;;  %v1175_v42 = vsel %vm1081_vm2, %v5371_v34, 0 }
 0x2cd   : > { %4155 = vmatprep.mubr.msk.bf16.mxu0 %vm4949_vm0, %v4948_v14  ;;  %4165 = vmatprep.subr.bf16.mxu0 %v4948_v14 }
 0x2ce   : > { %4161 = vmatprep.mubr.msk.bf16.mxu1 %vm4949_vm0, %v4948_v14  ;;  %4171 = vmatprep.subr.bf16.mxu1 %v4948_v14 }
 0x2d3   : > { %4156 = vmatmul.mubr.msk.bf16.vlgmr.msra.gmra.mrb[16].mxu0 %vm844_vm1, %v5336_v45 }
 0x2d4   : > { %4166 = vmatpush3.bf16.msra.mxu0 %v1129_v46  ;;  %4167 = vmatprep.mubr.msk.bf16.mxu0 %vm4949_vm0, %v4948_v14 }
 0x2d5   : > { %4177 = vmatprep.subr.bf16.mxu0 %v4948_v14 }
 0x396   : > { %v885_v47 = vpop.f32.mrb[8].mxu0 }
 0x397   : > { %v4139_v48 = vpop.f32.mrb[9].mxu0  ;;  %v1030_v49 = vsel %vm1029_vm3, %v885_v47, -inf }
 0x398   : > { %1031 = vmax.xlane.f32.xlu0 %v1030_v49  ;;  %v888_v50 = vpop.f32.mrb[10].mxu0 }
 0x399   : > { %v4140_v51 = vpop.f32.mrb[11].mxu0 }
 0x39e   : > { %v931_v52 = vpop.f32.mrb[12].mxu0  ;;  %v977_v53 = vpop.f32.mrb[4].mxu1 }
 0x39f   : > { %v4145_v54 = vpop.f32.mrb[13].mxu0  ;;  %v4151_v55 = vpop.f32.mrb[5].mxu1  ;;  %v1036_v56 = vsel %vm1029_vm3, %v977_v53, -inf  ;;  %v1033_v57 = vsel %vm1029_vm3, %v931_v52, -inf }
 0x3a0   : > { %v980_v58 = vpop.f32.mrb[6].mxu1  ;;  %1037 = vmax.xlane.f32.xlu0 %v1036_v56  ;;  %1034 = vmax.xlane.f32.xlu1 %v1033_v57  ;;  %v934_v59 = vpop.f32.mrb[14].mxu0 }
 0x3a1   : > { %v4146_v60 = vpop.f32.mrb[15].mxu0  ;;  %v4152_v61 = vpop.f32.mrb[7].mxu1 }
 0x3a6   : > { %v1023_v62 = vpop.f32.mrb[16].mxu0 }
 0x3a7   : > { %v4157_v63 = vpop.f32.mrb[17].mxu0  ;;  %v1039_v0 = vsel %vm1029_vm3, %v1023_v62, -inf }
 0x3a8   : > { %1040 = vmax.xlane.f32.xlu1 %v1039_v0  ;;  %v1026_v1 = vpop.f32.mrb[18].mxu0 }
 0x3a9   : > { %v4158_v2 = vpop.f32.mrb[19].mxu0 }
 0x425   : > { %v1032_v3 = vpop.xlane.xlu0 %1031 }
 0x426   : > { %v1042_v4 = vsub.f32 %v885_v47, %v1032_v3 }
 0x428   : > { %v1046_v5 = vmul.f32 1.442695, %v1042_v4 }
 0x42a   : > { %4608 = vpow2.f32 %v1046_v5 }
 0x42d   : > { %v1038_v6 = vpop.xlane.xlu0 %1037  ;;  %v1035_v7 = vpop.xlane.xlu1 %1034 }
 0x42e   : > { %v1044_v8 = vsub.f32 %v977_v53, %v1038_v6  ;;  %v1043_v9 = vsub.f32 %v931_v52, %v1035_v7  ;;  %v1221_v53 = vsel %vm1081_vm2, %v5381_v19, 0 }
 0x430   : > { %v1050_v10 = vmul.f32 1.442695, %v1044_v8  ;;  %v1048_v11 = vmul.f32 1.442695, %v1043_v9 }
 0x432   : > { %4610 = vpow2.f32 %v1050_v10 }
 0x433   : > { %4612 = vpow2.f32 %v1048_v11 }
 0x434   : > { %v4609_v12 = vpop.eup %4608 }
 0x435   : > { %v1054_v13 = vsel %vm1029_vm3, %v4609_v12, 0.0  ;;  %v1041_v21 = vpop.xlane.xlu1 %1040 }
 0x436   : > { %1055 = vadd.xlane.f32.xlu0 %v1054_v13  ;;  %v1045_v22 = vsub.f32 %v1023_v62, %v1041_v21 }
 0x438   : > { %v1052_v24 = vmul.f32 1.442695, %v1045_v22 }
 0x43a   : > { %4614 = vpow2.f32 %v1052_v24 }
 0x43c   : > { %v4611_v15 = vpop.eup %4610 }
 0x43d   : > { %v4613_v17 = vpop.eup %4612  ;;  %v1060_v18 = vsel %vm1029_vm3, %v4611_v15, 0.0 }
 0x43e   : > { %1061 = vadd.xlane.f32.xlu0 %v1060_v18  ;;  %v1057_v20 = vsel %vm1029_vm3, %v4613_v17, 0.0 }
 0x43f   : > { %1058 = vadd.xlane.f32.xlu1 %v1057_v20 }
 0x444   : > { %v4615_v26 = vpop.eup %4614 }
 0x445   : > { %v1063_v27 = vsel %vm1029_vm3, %v4615_v26, 0.0 }
 0x450   : > { %1319 = vrot.lane.b32.xlu1 %v5296_v25, %s4950_s28 }
 0x454   : > { %1264 = vrot.lane.b32.xlu1 %v5298_v28, %s4950_s28  ;;  %1267 = vrot.lane.b32.xlu0 %v5287_v16, %s4950_s28 }
 0x458   : > { %1371 = vrot.lane.b32.xlu0 %v5300_v29, %s4950_s28 }
 0x45c   : > { %1368 = vrot.lane.b32.xlu0 %v5318_v40, %s4950_s28 }
 0x478   : > { %1064 = vadd.xlane.f32.xlu1 %v1063_v27 }
 0x489   : > { %1316 = vrot.lane.b32.xlu1 %v5316_v38, %s4950_s28 }
 0x48d   : > { %1423 = vrot.lane.b32.xlu1 %v5314_v37, %s4950_s28 }
 0x491   : > { %1420 = vrot.lane.b32.xlu1 %v5336_v45, %s4950_s28 }
 0x4c3   : > { %v1056_v30 = vpop.xlane.xlu0 %1055 }
 0x4c4   : > { %4616 = vrcp.f32 %v1056_v30 }
 0x4cb   : > { %v1062_v31 = vpop.xlane.xlu0 %1061 }
 0x4cc   : > { %4618 = vrcp.f32 %v1062_v31  ;;  %v1059_v32 = vpop.xlane.xlu1 %1058 }
 0x4cd   : > { %4620 = vrcp.f32 %v1059_v32 }
 0x4ce   : > { %v4617_v33 = vpop.eup %4616 }
 0x4cf   : > { %v1070_v35 = vmul.f32 %v4617_v33, %v4609_v12  ;;  %v1268_v49 = vpop.permute.xlu0 %1267 }
 0x4d0   : > { %v1273_v52 = vsel %vm844_vm1, %v1268_v49, 0  ;;  %v1320_v54 = vpop.permute.xlu1 %1319 }
 0x4d1   : > { %v1074_v41 = vpack.c.bf16 %v1070_v35, %v1070_v35  ;;  %v1325_v63 = vsel %vm844_vm1, %v1320_v54, 0 }
 0x4d3   : > { %4162 = vmatmul.mubr.msk.bf16.vlgmr.msra.gmra.mrb[8].mxu1 %vm1029_vm3, %v1074_v41  ;;  %v1372_v23 = vpop.permute.xlu0 %1371 }
 0x4d4   : > { %4172 = vmatpush3.bf16.msra.mxu1 %v1175_v42  ;;  %4173 = vmatprep.mubr.msk.bf16.mxu1 %vm4949_vm0, %v4948_v14  ;;  %v1265_v55 = vpop.permute.xlu1 %1264  ;;  %v1377_v56 = vsel %vm844_vm1, %v1372_v23, 0 }
 0x4d5   : > { %4183 = vmatprep.subr.bf16.mxu1 %v4948_v14 }
 0x4d6   : > { %v4619_v43 = vpop.eup %4618 }
 0x4d7   : > { %v4621_v46 = vpop.eup %4620  ;;  %v1072_v47 = vmul.f32 %v4619_v43, %v4611_v15  ;;  %v1369_v57 = vpop.permute.xlu0 %1368 }
 0x4d8   : > { %v1071_v48 = vmul.f32 %v4621_v46, %v4613_v17 }
 0x4d9   : > { %v1076_v50 = vpack.c.bf16 %v1072_v47, %v1072_v47 }
 0x4da   : > { %v1075_v51 = vpack.c.bf16 %v1071_v48, %v1071_v48 }
 0x4db   : > { %4174 = vmatmul.mubr.msk.bf16.vlgmr.msra.gmra.mrb[12].mxu1 %vm1029_vm3, %v1076_v50 }
 0x4dc   : > { %4168 = vmatmul.mubr.msk.bf16.vlgmr.msra.gmra.mrb[20].mxu0 %vm1029_vm3, %v1075_v51  ;;  %4185 = vmatprep.mubr.msk.bf16.mxu1 %vm4949_vm0, %v4948_v14 }
 0x4dd   : > { %4178 = vmatpush3.bf16.msra.mxu0 %v1221_v53  ;;  %4184 = vmatpush3.bf16.xpose.msra.mxu1 %v1273_v52 }
 0x4de   : > { %4195 = vmatprep.subr.bf16.mxu1 %v4948_v14  ;;  %4179 = vmatprep.mubr.msk.bf16.mxu0 %vm4949_vm0, %v4948_v14 }
 0x4df   : > { %4189 = vmatprep.subr.bf16.mxu0 %v4948_v14 }
 0x4e4   : > { %4186 = vmatmul.mubr.msk.bf16.vlgmr.msra.gmra.mrb[16].mxu1 %vm844_vm1, %v1265_v55 }
 0x4e5   : > { %4196 = vmatpush3.bf16.xpose.msra.mxu1 %v1377_v56  ;;  %4197 = vmatprep.mubr.msk.bf16.mxu1 %vm4949_vm0, %v4948_v14 }
 0x4e6   : > { %4207 = vmatprep.subr.bf16.mxu1 %v4948_v14 }
 0x4ec   : > { %4198 = vmatmul.mubr.msk.bf16.vlgmr.msra.gmra.mrb[20].mxu1 %vm844_vm1, %v1369_v57 }
 0x4ed   : > { %4209 = vmatprep.mubr.msk.bf16.mxu1 %vm4949_vm0, %v4948_v14 }
 0x505   : > { %v1065_v58 = vpop.xlane.xlu1 %1064 }
 0x506   : > { %4622 = vrcp.f32 %v1065_v58 }
 0x509   : > { %v1317_v62 = vpop.permute.xlu1 %1316 }
 0x50d   : > { %v1424_v0 = vpop.permute.xlu1 %1423 }
 0x50e   : > { %v1429_v1 = vsel %vm844_vm1, %v1424_v0, 0 }
 0x510   : > { %v4623_v59 = vpop.eup %4622 }
 0x511   : > { %v1073_v60 = vmul.f32 %v4623_v59, %v4615_v26  ;;  %v1421_v2 = vpop.permute.xlu1 %1420 }
 0x513   : > { %v1077_v61 = vpack.c.bf16 %v1073_v60, %v1073_v60 }
 0x515   : > { %4180 = vmatmul.mubr.msk.bf16.vlgmr.msra.gmra.mrb[24].mxu0 %vm1029_vm3, %v1077_v61 }
 0x516   : > { %4190 = vmatpush3.bf16.xpose.msra.mxu0 %v1325_v63  ;;  %4191 = vmatprep.mubr.msk.bf16.mxu0 %vm4949_vm0, %v4948_v14 }
 0x517   : > { %4201 = vmatprep.subr.bf16.mxu0 %v4948_v14 }
 0x51d   : > { %4192 = vmatmul.mubr.msk.bf16.vlgmr.msra.gmra.mrb[28].mxu0 %vm844_vm1, %v1317_v62 }
 0x51e   : > { %4202 = vmatpush3.bf16.xpose.msra.mxu0 %v1429_v1  ;;  %4203 = vmatprep.mubr.msk.bf16.mxu0 %vm4949_vm0, %v4948_v14 }
 0x51f   : > { %4213 = vmatprep.subr.bf16.mxu0 %v4948_v14 }
 0x525   : > { %4204 = vmatmul.mubr.msk.bf16.vlgmr.msra.gmra.mrb[32].mxu0 %vm844_vm1, %v1421_v2 }
 0x526   : > { %4215 = vmatprep.mubr.msk.bf16.mxu0 %vm4949_vm0, %v4948_v14 }
 0x5a6   : > { %v5415_v3 = vpop.f32.mrb[8].mxu1 }
 0x5a7   : > { %v4163_v4 = vpop.f32.mrb[9].mxu1 }
 0x5a8   : > { %v1122_v5 = vpop.f32.mrb[10].mxu1 }
 0x5a9   : > { %v4164_v6 = vpop.f32.mrb[11].mxu1 }
 0x5ae   : > { %v5417_v7 = vpop.f32.mrb[12].mxu1 }
 0x5af   : > { %v5419_v8 = vpop.f32.mrb[20].mxu0  ;;  %v4175_v9 = vpop.f32.mrb[13].mxu1 }
 0x5b0   : > { %v4169_v10 = vpop.f32.mrb[21].mxu0  ;;  %v1214_v11 = vpop.f32.mrb[14].mxu1 }
 0x5b1   : > { %v1168_v12 = vpop.f32.mrb[22].mxu0  ;;  %v4176_v13 = vpop.f32.mrb[15].mxu1 }
 0x5b2   : > { %v4170_v15 = vpop.f32.mrb[23].mxu0 }
 0x5b7   : > { %v1309_v17 = vpop.f32.mrb[16].mxu1 }
 0x5b8   : > { %v4187_v18 = vpop.f32.mrb[17].mxu1  ;;  %v1471_v20 = vsel %vm1029_vm3, %v1309_v17, -inf }
 0x5b9   : > { %1472 = vmax.xlane.f32.xlu0 %v1471_v20  ;;  %v1312_v21 = vpop.f32.mrb[18].mxu1 }
 0x5ba   : > { %v4188_v22 = vpop.f32.mrb[19].mxu1 }
 0x5bf   : > { %v1413_v24 = vpop.f32.mrb[20].mxu1 }
 0x5c0   : > { %v4199_v26 = vpop.f32.mrb[21].mxu1  ;;  %v1477_v27 = vsel %vm1029_vm3, %v1413_v24, -inf }
 0x5c1   : > { %1478 = vmax.xlane.f32.xlu0 %v1477_v27  ;;  %v1416_v30 = vpop.f32.mrb[22].mxu1 }
 0x5c2   : > { %v4200_v31 = vpop.f32.mrb[23].mxu1 }
 0x5e8   : > { %v5423_v32 = vpop.f32.mrb[24].mxu0 }
 0x5e9   : > { %v4181_v33 = vpop.f32.mrb[25].mxu0 }
 0x5ea   : > { %v1260_v35 = vpop.f32.mrb[26].mxu0 }
 0x5eb   : > { %v4182_v41 = vpop.f32.mrb[27].mxu0 }
 0x5f0   : > { %v1361_v42 = vpop.f32.mrb[28].mxu0 }
 0x5f1   : > { %v4193_v43 = vpop.f32.mrb[29].mxu0  ;;  %v1474_v46 = vsel %vm1029_vm3, %v1361_v42, -inf }
 0x5f2   : > { %1475 = vmax.xlane.f32.xlu1 %v1474_v46  ;;  %v1364_v47 = vpop.f32.mrb[30].mxu0 }
 0x5f3   : > { %v4194_v48 = vpop.f32.mrb[31].mxu0 }
 0x5f8   : > { %v1465_v49 = vpop.f32.mrb[32].mxu0 }
 0x5f9   : > { %v4205_v50 = vpop.f32.mrb[33].mxu0  ;;  %v1480_v51 = vsel %vm1029_vm3, %v1465_v49, -inf }
 0x5fa   : > { %1481 = vmax.xlane.f32.xlu0 %v1480_v51  ;;  %v1468_v52 = vpop.f32.mrb[34].mxu0 }
 0x5fb   : > { %v4206_v53 = vpop.f32.mrb[35].mxu0 }
 0x603   : > { %1569 = vrot.lane.b32.xlu1 %v5334_v44, %s4950_s28 }
 0x607   : > { %1618 = vrot.lane.b32.xlu1 %v5371_v34, %s4950_s28 }
 0x60b   : > { %1667 = vrot.lane.b32.xlu1 %v5381_v19, %s4950_s28 }
 0x646   : > { %v1473_v54 = vpop.xlane.xlu0 %1472 }
 0x647   : > { %v1483_v23 = vsub.f32 %v1309_v17, %v1473_v54 }
 0x649   : > { %v1487_v55 = vmul.f32 1.442695, %v1483_v23 }
 0x64b   : > { %4624 = vpow2.f32 %v1487_v55 }
 0x64e   : > { %v1479_v58 = vpop.xlane.xlu0 %1478 }
 0x64f   : > { %v1485_v59 = vsub.f32 %v1413_v24, %v1479_v58 }
 0x651   : > { %v1491_v60 = vmul.f32 1.442695, %v1485_v59 }
 0x653   : > { %4626 = vpow2.f32 %v1491_v60 }
 0x655   : > { %v4625_v56 = vpop.eup %4624 }
 0x656   : > { %v1495_v57 = vsel %vm1029_vm3, %v4625_v56, 0.0 }
 0x657   : > { %1496 = vadd.xlane.f32.xlu0 %v1495_v57 }
 0x65d   : > { %v4627_v2 = vpop.eup %4626 }
 0x65e   : > { %v1501_v4 = vsel %vm1029_vm3, %v4627_v2, 0.0 }
 0x66d   : > { %1520 = vrot.lane.b32.xlu0 %v5312_v36, %s4950_s28 }
 0x67f   : > { %v1476_v61 = vpop.xlane.xlu1 %1475 }
 0x680   : > { %v1484_v62 = vsub.f32 %v1361_v42, %v1476_v61 }
 0x682   : > { %v1489_v63 = vmul.f32 1.442695, %v1484_v62 }
 0x683   : > { %v1570_v0 = vpop.permute.xlu1 %1569 }
 0x684   : > { %4628 = vpow2.f32 %v1489_v63  ;;  %v1575_v1 = vsel %vm1081_vm2, %v1570_v0, 0 }
 0x685   : > { %4214 = vmatpush3.bf16.msra.mxu0 %v1575_v1 }
 0x686   : > { %4225 = vmatprep.subr.bf16.mxu0 %v4948_v14 }
 0x687   : > { %v1482_v9 = vpop.xlane.xlu0 %1481  ;;  %v1619_v22 = vpop.permute.xlu1 %1618 }
 0x688   : > { %v1486_v10 = vsub.f32 %v1465_v49, %v1482_v9  ;;  %v1624_v26 = vsel %vm1081_vm2, %v1619_v22, 0 }
 0x68a   : > { %v1493_v11 = vmul.f32 1.442695, %v1486_v10 }
 0x68b   : > { %v1668_v27 = vpop.permute.xlu1 %1667 }
 0x68c   : > { %1502 = vadd.xlane.f32.xlu0 %v1501_v4  ;;  %4630 = vpow2.f32 %v1493_v11  ;;  %v1673_v50 = vsel %vm1081_vm2, %v1668_v27, 0 }
 0x68e   : > { %v4629_v5 = vpop.eup %4628 }
 0x68f   : > { %v1498_v6 = vsel %vm1029_vm3, %v4629_v5, 0.0 }
 0x690   : > { %1499 = vadd.xlane.f32.xlu1 %v1498_v6 }
 0x696   : > { %v4631_v12 = vpop.eup %4630 }
 0x697   : > { %v1504_v13 = vsel %vm1029_vm3, %v4631_v12, 0.0 }
 0x6a1   : > { %1767 = vrot.lane.b32.xlu1 %v5296_v25, %s4951_s3 }
 0x6a2   : > { %1717 = vrot.lane.b32.xlu0 %v5287_v16, %s4951_s3 }
 0x6a6   : > { %1715 = vrot.lane.b32.xlu0 %v5298_v28, %s4951_s3 }
 0x6aa   : > { %1817 = vrot.lane.b32.xlu0 %v5300_v29, %s4951_s3 }
 0x6ae   : > { %1815 = vrot.lane.b32.xlu0 %v5318_v40, %s4951_s3 }
 0x6c5   : > { %1505 = vadd.xlane.f32.xlu1 %v1504_v13 }
 0x6d6   : > { %1765 = vrot.lane.b32.xlu1 %v5316_v38, %s4951_s3 }
 0x6da   : > { %1867 = vrot.lane.b32.xlu1 %v5314_v37, %s4951_s3 }
 0x6de   : > { %1865 = vrot.lane.b32.xlu1 %v5336_v45, %s4951_s3 }
 0x6e4   : > { %v1497_v15 = vpop.xlane.xlu0 %1496 }
 0x6e5   : > { %4632 = vrcp.f32 %v1497_v15 }
 0x6e8   : > { %v1521_v17 = vpop.permute.xlu0 %1520 }
 0x6e9   : > { %v1526_v18 = vsel %vm1081_vm2, %v1521_v17, 0 }
 0x6ea   : > { %4208 = vmatpush3.bf16.msra.mxu1 %v1526_v18 }
 0x6eb   : > { %4219 = vmatprep.subr.bf16.mxu1 %v4948_v14 }
 0x6ef   : > { %v4633_v20 = vpop.eup %4632 }
 0x6f0   : > { %v1511_v21 = vmul.f32 %v4633_v20, %v4625_v56 }
 0x6f2   : > { %v1515_v24 = vpack.c.bf16 %v1511_v21, %v1511_v21 }
 0x6f4   : > { %4210 = vmatmul.mubr.msk.bf16.vlgmr.msra.gmra.mrb[24].mxu1 %vm1029_vm3, %v1515_v24 }
 0x6f5   : > { %4220 = vmatpush3.bf16.msra.mxu1 %v1624_v26  ;;  %4221 = vmatprep.mubr.msk.bf16.mxu1 %vm4949_vm0, %v4948_v14 }
 0x6f6   : > { %4231 = vmatprep.subr.bf16.mxu1 %v4948_v14 }
 0x719   : > { %v1503_v30 = vpop.xlane.xlu0 %1502 }
 0x71a   : > { %4634 = vrcp.f32 %v1503_v30 }
 0x71d   : > { %v1500_v31 = vpop.xlane.xlu1 %1499  ;;  %v1718_v33 = vpop.permute.xlu0 %1717 }
 0x71e   : > { %4636 = vrcp.f32 %v1500_v31  ;;  %v1723_v48 = vsel %vm844_vm1, %v1718_v33, 0 }
 0x721   : > { %v1716_v46 = vpop.permute.xlu0 %1715  ;;  %v1768_v54 = vpop.permute.xlu1 %1767 }
 0x722   : > { %v1773_v59 = vsel %vm844_vm1, %v1768_v54, 0 }
 0x724   : > { %v4635_v35 = vpop.eup %4634 }
 0x725   : > { %v1513_v41 = vmul.f32 %v4635_v35, %v4627_v2  ;;  %v1818_v51 = vpop.permute.xlu0 %1817 }
 0x726   : > { %v1823_v52 = vsel %vm844_vm1, %v1818_v51, 0 }
 0x727   : > { %v1517_v42 = vpack.c.bf16 %v1513_v41, %v1513_v41 }
 0x728   : > { %v4637_v43 = vpop.eup %4636 }
 0x729   : > { %v1512_v47 = vmul.f32 %v4637_v43, %v4629_v5  ;;  %4222 = vmatmul.mubr.msk.bf16.vlgmr.msra.gmra.mrb[28].mxu1 %vm1029_vm3, %v1517_v42  ;;  %v1816_v53 = vpop.permute.xlu0 %1815 }
 0x72a   : > { %4232 = vmatpush3.bf16.xpose.msra.mxu1 %v1723_v48  ;;  %4233 = vmatprep.mubr.msk.bf16.mxu1 %vm4949_vm0, %v4948_v14 }
 0x72b   : > { %v1516_v49 = vpack.c.bf16 %v1512_v47, %v1512_v47  ;;  %4243 = vmatprep.subr.bf16.mxu1 %v4948_v14 }
 0x72d   : > { %4216 = vmatmul.mubr.msk.bf16.vlgmr.msra.gmra.mrb[36].mxu0 %vm1029_vm3, %v1516_v49 }
 0x72e   : > { %4226 = vmatpush3.bf16.msra.mxu0 %v1673_v50  ;;  %4227 = vmatprep.mubr.msk.bf16.mxu0 %vm4949_vm0, %v4948_v14 }
 0x72f   : > { %4237 = vmatprep.subr.bf16.mxu0 %v4948_v14 }
 0x731   : > { %4234 = vmatmul.mubr.msk.bf16.vlgmr.msra.gmra.mrb[32].mxu1 %vm844_vm1, %v1716_v46 }
 0x732   : > { %4244 = vmatpush3.bf16.xpose.msra.mxu1 %v1823_v52  ;;  %4245 = vmatprep.mubr.msk.bf16.mxu1 %vm4949_vm0, %v4948_v14 }
 0x733   : > { %4255 = vmatprep.subr.bf16.mxu1 %v4948_v14 }
 0x739   : > { %4246 = vmatmul.mubr.msk.bf16.vlgmr.msra.gmra.mrb[36].mxu1 %vm844_vm1, %v1816_v53 }
 0x73a   : > { %4257 = vmatprep.mubr.msk.bf16.mxu1 %vm4949_vm0, %v4948_v14 }
 0x752   : > { %v1506_v23 = vpop.xlane.xlu1 %1505 }
 0x753   : > { %4638 = vrcp.f32 %v1506_v23 }
 0x756   : > { %v1766_v58 = vpop.permute.xlu1 %1765 }
 0x75a   : > { %v1868_v60 = vpop.permute.xlu1 %1867 }
 0x75b   : > { %v1873_v61 = vsel %vm844_vm1, %v1868_v60, 0 }
 0x75d   : > { %v4639_v55 = vpop.eup %4638 }
 0x75e   : > { %v1514_v56 = vmul.f32 %v4639_v55, %v4631_v12  ;;  %v1866_v62 = vpop.permute.xlu1 %1865 }
 0x760   : > { %v1518_v57 = vpack.c.bf16 %v1514_v56, %v1514_v56 }
 0x762   : > { %4228 = vmatmul.mubr.msk.bf16.vlgmr.msra.gmra.mrb[40].mxu0 %vm1029_vm3, %v1518_v57 }
 0x763   : > { %4238 = vmatpush3.bf16.xpose.msra.mxu0 %v1773_v59  ;;  %4239 = vmatprep.mubr.msk.bf16.mxu0 %vm4949_vm0, %v4948_v14 }
 0x764   : > { %4249 = vmatprep.subr.bf16.mxu0 %v4948_v14 }
 0x76a   : > { %4240 = vmatmul.mubr.msk.bf16.vlgmr.msra.gmra.mrb[44].mxu0 %vm844_vm1, %v1766_v58 }
 0x76b   : > { %4250 = vmatpush3.bf16.xpose.msra.mxu0 %v1873_v61  ;;  %4251 = vmatprep.mubr.msk.bf16.mxu0 %vm4949_vm0, %v4948_v14 }
 0x76c   : > { %4261 = vmatprep.subr.bf16.mxu0 %v4948_v14 }
 0x772   : > { %4252 = vmatmul.mubr.msk.bf16.vlgmr.msra.gmra.mrb[48].mxu0 %vm844_vm1, %v1866_v62 }
 0x773   : > { %4263 = vmatprep.mubr.msk.bf16.mxu0 %vm4949_vm0, %v4948_v14 }
 0x7c7   : > { %v5495_v63 = vpop.f32.mrb[24].mxu1 }
 0x7c8   : > { %v4211_v0 = vpop.f32.mrb[25].mxu1 }
 0x7c9   : > { %v1565_v1 = vpop.f32.mrb[26].mxu1 }
 0x7ca   : > { %v4212_v2 = vpop.f32.mrb[27].mxu1 }
 0x7fc   : > { %v5497_v4 = vpop.f32.mrb[28].mxu1 }
 0x7fd   : > { %v4223_v5 = vpop.f32.mrb[29].mxu1 }
 0x7fe   : > { %v1663_v6 = vpop.f32.mrb[30].mxu1 }
 0x7ff   : > { %v4224_v9 = vpop.f32.mrb[31].mxu1 }
 0x800   : > { %v5499_v10 = vpop.f32.mrb[36].mxu0 }
 0x801   : > { %v4450_v11 = vpack.i.bf16 %v5499_v10, %v5495_v63  ;;  %v4217_v12 = vpop.f32.mrb[37].mxu0 }
 0x802   : > { %v1614_v13 = vpop.f32.mrb[38].mxu0 }
 0x803   : > { %v4218_v15 = vpop.f32.mrb[39].mxu0 }
 0x804   : > { %v1759_v17 = vpop.f32.mrb[32].mxu1 }
 0x805   : > { %v4235_v18 = vpop.f32.mrb[33].mxu1  ;;  %v1915_v20 = vsel %vm1029_vm3, %v1759_v17, -inf }
 0x806   : > { %1916 = vmax.xlane.f32.xlu0 %v1915_v20  ;;  %v1762_v21 = vpop.f32.mrb[34].mxu1 }
 0x807   : > { %v4236_v22 = vpop.f32.mrb[35].mxu1 }
 0x80c   : > { %v1859_v24 = vpop.f32.mrb[36].mxu1 }
 0x80d   : > { %v4247_v26 = vpop.f32.mrb[37].mxu1  ;;  %v1921_v27 = vsel %vm1029_vm3, %v1859_v24, -inf }
 0x80e   : > { %1922 = vmax.xlane.f32.xlu0 %v1921_v27  ;;  %v1862_v30 = vpop.f32.mrb[38].mxu1 }
 0x80f   : > { %v4248_v31 = vpop.f32.mrb[39].mxu1 }
 0x835   : > { %v5505_v33 = vpop.f32.mrb[40].mxu0 }
 0x836   : > { %v4455_v35 = vpack.i.bf16 %v5505_v33, %v5497_v4  ;;  %v4229_v41 = vpop.f32.mrb[41].mxu0 }
 0x837   : > { %v1712_v42 = vpop.f32.mrb[42].mxu0 }
 0x838   : > { %v4230_v43 = vpop.f32.mrb[43].mxu0 }
 0x83d   : > { %v1809_v46 = vpop.f32.mrb[44].mxu0 }
 0x83e   : > { %v4241_v47 = vpop.f32.mrb[45].mxu0  ;;  %v1918_v48 = vsel %vm1029_vm3, %v1809_v46, -inf }
 0x83f   : > { %1919 = vmax.xlane.f32.xlu1 %v1918_v48  ;;  %v1812_v49 = vpop.f32.mrb[46].mxu0 }
 0x840   : > { %v4242_v50 = vpop.f32.mrb[47].mxu0 }
 0x845   : > { %v1909_v51 = vpop.f32.mrb[48].mxu0 }
 0x846   : > { %v4253_v52 = vpop.f32.mrb[49].mxu0  ;;  %v1924_v53 = vsel %vm1029_vm3, %v1909_v51, -inf }
 0x847   : > { %1925 = vmax.xlane.f32.xlu0 %v1924_v53  ;;  %v1912_v54 = vpop.f32.mrb[50].mxu0 }
 0x848   : > { %v4254_v23 = vpop.f32.mrb[51].mxu0 }
 0x850   : > { %2011 = vrot.lane.b32.xlu1 %v5334_v44, %s4951_s3 }
 0x854   : > { %2059 = vrot.lane.b32.xlu1 %v5371_v34, %s4951_s3 }
 0x858   : > { %2107 = vrot.lane.b32.xlu1 %v5381_v19, %s4951_s3 }
 0x893   : > { %v1917_v55 = vpop.xlane.xlu0 %1916 }
 0x894   : > { %v1927_v56 = vsub.f32 %v1759_v17, %v1917_v55 }
 0x896   : > { %v1931_v57 = vmul.f32 1.442695, %v1927_v56 }
 0x898   : > { %4640 = vpow2.f32 %v1931_v57 }
 0x89b   : > { %v1923_v60 = vpop.xlane.xlu0 %1922 }
 0x89c   : > { %v1929_v61 = vsub.f32 %v1859_v24, %v1923_v60 }
 0x89e   : > { %v1935_v62 = vmul.f32 1.442695, %v1929_v61 }
 0x8a0   : > { %4642 = vpow2.f32 %v1935_v62 }
 0x8a2   : > { %v4641_v58 = vpop.eup %4640 }
 0x8a3   : > { %v1939_v59 = vsel %vm1029_vm3, %v4641_v58, 0.0 }
 0x8a4   : > { %1940 = vadd.xlane.f32.xlu0 %v1939_v59 }
 0x8aa   : > { %v4643_v9 = vpop.eup %4642 }
 0x8ab   : > { %v1945_v12 = vsel %vm1029_vm3, %v4643_v9, 0.0 }
 0x8ba   : > { %1963 = vrot.lane.b32.xlu0 %v5312_v36, %s4951_s3 }
 0x8cc   : > { %v1920_v0 = vpop.xlane.xlu1 %1919 }
 0x8cd   : > { %v1928_v1 = vsub.f32 %v1809_v46, %v1920_v0 }
 0x8cf   : > { %v1933_v2 = vmul.f32 1.442695, %v1928_v1 }
 0x8d0   : > { %v2012_v5 = vpop.permute.xlu1 %2011 }
 0x8d1   : > { %4644 = vpow2.f32 %v1933_v2  ;;  %v2017_v6 = vsel %vm1081_vm2, %v2012_v5, 0 }
 0x8d2   : > { %4262 = vmatpush3.bf16.msra.mxu0 %v2017_v6 }
 0x8d3   : > { %4273 = vmatprep.subr.bf16.mxu0 %v4948_v14 }
 0x8d4   : > { %v1926_v17 = vpop.xlane.xlu0 %1925  ;;  %v2060_v24 = vpop.permute.xlu1 %2059 }
 0x8d5   : > { %v1930_v18 = vsub.f32 %v1909_v51, %v1926_v17 }
 0x8d7   : > { %v1937_v20 = vmul.f32 1.442695, %v1930_v18 }
 0x8d9   : > { %1946 = vadd.xlane.f32.xlu0 %v1945_v12  ;;  %4646 = vpow2.f32 %v1937_v20 }
 0x8db   : > { %v4645_v13 = vpop.eup %4644 }
 0x8dc   : > { %v1942_v15 = vsel %vm1029_vm3, %v4645_v13, 0.0 }
 0x8dd   : > { %1943 = vadd.xlane.f32.xlu1 %v1942_v15 }
 0x8e3   : > { %v4647_v21 = vpop.eup %4646 }
 0x8e4   : > { %v1948_v22 = vsel %vm1029_vm3, %v4647_v21, 0.0 }
 0x8ee   : > { %2207 = vrot.lane.b32.xlu1 %v5296_v25, %s4952_s18 }
 0x8ef   : > { %2157 = vrot.lane.b32.xlu0 %v5287_v16, %s4952_s18 }
 0x8f3   : > { %2155 = vrot.lane.b32.xlu0 %v5298_v28, %s4952_s18 }
 0x8f7   : > { %2257 = vrot.lane.b32.xlu0 %v5300_v29, %s4952_s18 }
 0x8fb   : > { %2255 = vrot.lane.b32.xlu0 %v5318_v40, %s4952_s18 }
 0x912   : > { %1949 = vadd.xlane.f32.xlu1 %v1948_v22 }
 0x923   : > { %2205 = vrot.lane.b32.xlu1 %v5316_v38, %s4952_s18  ;;  %v2065_v38 = vsel %vm1081_vm2, %v2060_v24, 0 }
 0x927   : > { %2307 = vrot.lane.b32.xlu1 %v5314_v37, %s4952_s18  ;;  %v2108_v37 = vpop.permute.xlu1 %2107 }
 0x928   : > { %v2113_v50 = vsel %vm1081_vm2, %v2108_v37, 0 }
 0x92b   : > { %2305 = vrot.lane.b32.xlu1 %v5336_v45, %s4952_s18 }
 0x931   : > { %v1941_v16 = vpop.xlane.xlu0 %1940 }
 0x932   : > { %4648 = vrcp.f32 %v1941_v16 }
 0x935   : > { %v1964_v25 = vpop.permute.xlu0 %1963 }
 0x936   : > { %v1969_v28 = vsel %vm1081_vm2, %v1964_v25, 0 }
 0x937   : > { %4256 = vmatpush3.bf16.msra.mxu1 %v1969_v28 }
 0x938   : > { %4267 = vmatprep.subr.bf16.mxu1 %v4948_v14 }
 0x93c   : > { %v4649_v29 = vpop.eup %4648 }
 0x93d   : > { %v1955_v40 = vmul.f32 %v4649_v29, %v4641_v58 }
 0x93f   : > { %v1959_v26 = vpack.c.bf16 %v1955_v40, %v1955_v40 }
 0x941   : > { %4258 = vmatmul.mubr.msk.bf16.vlgmr.msra.gmra.mrb[40].mxu1 %vm1029_vm3, %v1959_v26 }
 0x942   : > { %4268 = vmatpush3.bf16.msra.mxu1 %v2065_v38  ;;  %4269 = vmatprep.mubr.msk.bf16.mxu1 %vm4949_vm0, %v4948_v14 }
 0x943   : > { %4279 = vmatprep.subr.bf16.mxu1 %v4948_v14 }
 0x966   : > { %v1947_v45 = vpop.xlane.xlu0 %1946 }
 0x967   : > { %4650 = vrcp.f32 %v1947_v45 }
 0x96a   : > { %v1944_v27 = vpop.xlane.xlu1 %1943  ;;  %v2158_v30 = vpop.permute.xlu0 %2157 }
 0x96b   : > { %4652 = vrcp.f32 %v1944_v27  ;;  %v2163_v48 = vsel %vm844_vm1, %v2158_v30, 0 }
 0x96e   : > { %v2156_v46 = vpop.permute.xlu0 %2155  ;;  %v2208_v54 = vpop.permute.xlu1 %2207 }
 0x96f   : > { %v2213_v59 = vsel %vm844_vm1, %v2208_v54, 0 }
 0x971   : > { %v4651_v31 = vpop.eup %4650 }
 0x972   : > { %v1957_v41 = vmul.f32 %v4651_v31, %v4643_v9  ;;  %v2258_v51 = vpop.permute.xlu0 %2257 }
 0x973   : > { %v2263_v52 = vsel %vm844_vm1, %v2258_v51, 0 }
 0x974   : > { %v1961_v42 = vpack.c.bf16 %v1957_v41, %v1957_v41 }
 0x975   : > { %v4653_v43 = vpop.eup %4652 }
 0x976   : > { %v1956_v47 = vmul.f32 %v4653_v43, %v4645_v13  ;;  %4270 = vmatmul.mubr.msk.bf16.vlgmr.msra.gmra.mrb[44].mxu1 %vm1029_vm3, %v1961_v42  ;;  %v2256_v53 = vpop.permute.xlu0 %2255 }
 0x977   : > { %4280 = vmatpush3.bf16.xpose.msra.mxu1 %v2163_v48  ;;  %4281 = vmatprep.mubr.msk.bf16.mxu1 %vm4949_vm0, %v4948_v14 }
 0x978   : > { %v1960_v49 = vpack.c.bf16 %v1956_v47, %v1956_v47  ;;  %4291 = vmatprep.subr.bf16.mxu1 %v4948_v14 }
 0x97a   : > { %4264 = vmatmul.mubr.msk.bf16.vlgmr.msra.gmra.mrb[52].mxu0 %vm1029_vm3, %v1960_v49 }
 0x97b   : > { %4274 = vmatpush3.bf16.msra.mxu0 %v2113_v50  ;;  %4275 = vmatprep.mubr.msk.bf16.mxu0 %vm4949_vm0, %v4948_v14 }
 0x97c   : > { %4285 = vmatprep.subr.bf16.mxu0 %v4948_v14 }
 0x97e   : > { %4282 = vmatmul.mubr.msk.bf16.vlgmr.msra.gmra.mrb[48].mxu1 %vm844_vm1, %v2156_v46 }
 0x97f   : > { %4292 = vmatpush3.bf16.xpose.msra.mxu1 %v2263_v52  ;;  %4293 = vmatprep.mubr.msk.bf16.mxu1 %vm4949_vm0, %v4948_v14 }
 0x980   : > { %4303 = vmatprep.subr.bf16.mxu1 %v4948_v14 }
 0x986   : > { %4294 = vmatmul.mubr.msk.bf16.vlgmr.msra.gmra.mrb[52].mxu1 %vm844_vm1, %v2256_v53 }
 0x987   : > { %4305 = vmatprep.mubr.msk.bf16.mxu1 %vm4949_vm0, %v4948_v14 }
 0x99f   : > { %v1950_v23 = vpop.xlane.xlu1 %1949 }
 0x9a0   : > { %4654 = vrcp.f32 %v1950_v23 }
 0x9a3   : > { %v2206_v58 = vpop.permute.xlu1 %2205 }
 0x9a7   : > { %v2308_v60 = vpop.permute.xlu1 %2307 }
 0x9a8   : > { %v2313_v61 = vsel %vm844_vm1, %v2308_v60, 0 }
 0x9aa   : > { %v4655_v55 = vpop.eup %4654 }
 0x9ab   : > { %v1958_v56 = vmul.f32 %v4655_v55, %v4647_v21  ;;  %v2306_v62 = vpop.permute.xlu1 %2305 }
 0x9ad   : > { %v1962_v57 = vpack.c.bf16 %v1958_v56, %v1958_v56 }
 0x9af   : > { %4276 = vmatmul.mubr.msk.bf16.vlgmr.msra.gmra.mrb[56].mxu0 %vm1029_vm3, %v1962_v57 }
 0x9b0   : > { %4286 = vmatpush3.bf16.xpose.msra.mxu0 %v2213_v59  ;;  %4287 = vmatprep.mubr.msk.bf16.mxu0 %vm4949_vm0, %v4948_v14 }
 0x9b1   : > { %4297 = vmatprep.subr.bf16.mxu0 %v4948_v14 }
 0x9b7   : > { %4288 = vmatmul.mubr.msk.bf16.vlgmr.msra.gmra.mrb[60].mxu0 %vm844_vm1, %v2206_v58 }
 0x9b8   : > { %4298 = vmatpush3.bf16.xpose.msra.mxu0 %v2313_v61  ;;  %4299 = vmatprep.mubr.msk.bf16.mxu0 %vm4949_vm0, %v4948_v14 }
 0x9b9   : > { %4309 = vmatprep.subr.bf16.mxu0 %v4948_v14 }
 0x9bf   : > { %4300 = vmatmul.mubr.msk.bf16.vlgmr.msra.gmra.mrb[64].mxu0 %vm844_vm1, %v2306_v62 }
 0x9c0   : > { %4311 = vmatprep.mubr.msk.bf16.mxu0 %vm4949_vm0, %v4948_v14 }
 0xa14   : > { %v2005_v0 = vpop.f32.mrb[40].mxu1 }
 0xa15   : > { %v4259_v1 = vpop.f32.mrb[41].mxu1 }
 0xa16   : > { %v2008_v2 = vpop.f32.mrb[42].mxu1 }
 0xa17   : > { %v4260_v5 = vpop.f32.mrb[43].mxu1 }
 0xa49   : > { %v5579_v6 = vpop.f32.mrb[44].mxu1 }
 0xa4a   : > { %v4271_v9 = vpop.f32.mrb[45].mxu1 }
 0xa4b   : > { %v2104_v12 = vpop.f32.mrb[46].mxu1 }
 0xa4c   : > { %v4272_v13 = vpop.f32.mrb[47].mxu1 }
 0xa4d   : > { %v2053_v15 = vpop.f32.mrb[52].mxu0 }
 0xa4e   : > { %v4460_v17 = vpack.i.bf16 %v2053_v15, %v2005_v0  ;;  %v4265_v18 = vpop.f32.mrb[53].mxu0 }
 0xa4f   : > { %v2056_v20 = vpop.f32.mrb[54].mxu0 }
 0xa50   : > { %v4266_v21 = vpop.f32.mrb[55].mxu0 }
 0xa51   : > { %v2199_v22 = vpop.f32.mrb[48].mxu1 }
 0xa52   : > { %v4283_v16 = vpop.f32.mrb[49].mxu1  ;;  %v2355_v25 = vsel %vm1029_vm3, %v2199_v22, -inf }
 0xa53   : > { %2356 = vmax.xlane.f32.xlu0 %v2355_v25  ;;  %v2202_v28 = vpop.f32.mrb[50].mxu1 }
 0xa54   : > { %v4284_v29 = vpop.f32.mrb[51].mxu1 }
 0xa59   : > { %v2299_v40 = vpop.f32.mrb[52].mxu1 }
 0xa5a   : > { %v4295_v24 = vpop.f32.mrb[53].mxu1  ;;  %v2361_v26 = vsel %vm1029_vm3, %v2299_v40, -inf }
 0xa5b   : > { %2362 = vmax.xlane.f32.xlu0 %v2361_v26  ;;  %v2302_v38 = vpop.f32.mrb[54].mxu1 }
 0xa5c   : > { %v4296_v37 = vpop.f32.mrb[55].mxu1 }
 0xa82   : > { %v2149_v45 = vpop.f32.mrb[56].mxu0 }
 0xa83   : > { %v4465_v27 = vpack.i.bf16 %v2149_v45, %v5579_v6  ;;  %v4277_v30 = vpop.f32.mrb[57].mxu0 }
 0xa84   : > { %v2152_v31 = vpop.f32.mrb[58].mxu0 }
 0xa85   : > { %v4278_v41 = vpop.f32.mrb[59].mxu0 }
 0xa8a   : > { %v2249_v42 = vpop.f32.mrb[60].mxu0 }
 0xa8b   : > { %v4289_v43 = vpop.f32.mrb[61].mxu0  ;;  %v2358_v46 = vsel %vm1029_vm3, %v2249_v42, -inf }
 0xa8c   : > { %2359 = vmax.xlane.f32.xlu1 %v2358_v46  ;;  %v2252_v47 = vpop.f32.mrb[62].mxu0  ;;  %v4513_v43 = vld [vmem:[#allocation7 + $0x8] sm:$0xff]  }
 0xa8d   : > { %v4290_v48 = vpop.f32.mrb[63].mxu0 }
 0xa8e   : > { %v4514_v48 = vld [vmem:[#allocation7 + $0x10] sm:$0xff]  }
 0xa92   : > { %v2349_v49 = vpop.f32.mrb[64].mxu0 }
 0xa93   : > { %v4301_v50 = vpop.f32.mrb[65].mxu0  ;;  %v2364_v51 = vsel %vm1029_vm3, %v2349_v49, -inf }
 0xa94   : > { %2365 = vmax.xlane.f32.xlu0 %v2364_v51  ;;  %v2352_v52 = vpop.f32.mrb[66].mxu0 }
 0xa95   : > { %v4302_v53 = vpop.f32.mrb[67].mxu0 }
 0xae0   : > { %v2357_v54 = vpop.xlane.xlu0 %2356 }
 0xae1   : > { %v2367_v23 = vsub.f32 %v2199_v22, %v2357_v54 }
 0xae3   : > { %v2371_v55 = vmul.f32 1.442695, %v2367_v23  ;;  %v4515_v23 = vld [vmem:[#allocation7 + $0x18] sm:$0xff]  }
 0xae5   : > { %4656 = vpow2.f32 %v2371_v55  ;;  %v4516_v55 = vld [vmem:[#allocation7 + $0x20] sm:$0xff]  }
 0xae8   : > { %v2363_v56 = vpop.xlane.xlu0 %2362 }
 0xae9   : > { %v2369_v57 = vsub.f32 %v2299_v40, %v2363_v56  ;;  %v4517_v56 = vld [vmem:[#allocation7 + $0x28] sm:$0xff]  }
 0xaeb   : > { %v2375_v58 = vmul.f32 1.442695, %v2369_v57  ;;  %v4518_v57 = vld [vmem:[#allocation7 + $0x30] sm:$0xff]  }
 0xaed   : > { %4658 = vpow2.f32 %v2375_v58  ;;  %v4519_v58 = vld [vmem:[#allocation7 + $0x38] sm:$0xff]  }
 0xaef   : > { %v4657_v59 = vpop.eup %4656 }
 0xaf0   : > { %v2379_v60 = vsel %vm1029_vm3, %v4657_v59, 0.0 }
 0xaf1   : > { %2380 = vadd.xlane.f32.xlu0 %v2379_v60 }
 0xaf7   : > { %v4659_v61 = vpop.eup %4658 }
 0xaf8   : > { %v2385_v62 = vsel %vm1029_vm3, %v4659_v61, 0.0 }
 0xaf9   : > { %2386 = vadd.xlane.f32.xlu0 %v2385_v62 }
 0xb0f   : > { %2403 = vrot.lane.b32.xlu0 %v5312_v36, %s4952_s18 }
 0xb13   : > { %4451 = vrot.lane.b32.xlu0 %v4450_v11, %s4952_s18 }
 0xb17   : > { %4461 = vrot.lane.b32.xlu0 %v4460_v17, %s4951_s3 }
 0xb19   : > { %v2360_v0 = vpop.xlane.xlu1 %2359 }
 0xb1a   : > { %v2368_v1 = vsub.f32 %v2249_v42, %v2360_v0  ;;  %v4512_v42 = vld [vmem:[#allocation7] sm:$0xff]  }
 0xb1c   : > { %v2373_v2 = vmul.f32 1.442695, %v2368_v1 }
 0xb1e   : > { %4660 = vpow2.f32 %v2373_v2 }
 0xb21   : > { %v2366_v36 = vpop.xlane.xlu0 %2365 }
 0xb22   : > { %v2370_v9 = vsub.f32 %v2349_v49, %v2366_v36 }
 0xb24   : > { %v2377_v63 = vmul.f32 1.442695, %v2370_v9 }
 0xb26   : > { %4662 = vpow2.f32 %v2377_v63 }
 0xb28   : > { %v4661_v5 = vpop.eup %4660 }
 0xb29   : > { %v2382_v6 = vsel %vm1029_vm3, %v4661_v5, 0.0 }
 0xb2a   : > { %2383 = vadd.xlane.f32.xlu1 %v2382_v6 }
 0xb30   : > { %v4663_v10 = vpop.eup %4662 }
 0xb31   : > { %v2388_v11 = vsel %vm1029_vm3, %v4663_v10, 0.0 }
 0xb3b   : > { %2451 = vrot.lane.b32.xlu1 %v5334_v44, %s4952_s18 }
 0xb3f   : > { %2499 = vrot.lane.b32.xlu1 %v5371_v34, %s4952_s18 }
 0xb63   : > { %2389 = vadd.xlane.f32.xlu1 %v2388_v11 }
 0xb74   : > { %2547 = vrot.lane.b32.xlu1 %v5381_v19, %s4952_s18 }
 0xb78   : > { %4456 = vrot.lane.b32.xlu1 %v4455_v35, %s4952_s18  ;;  %s489_s18 = scalar_lea.vmem [#allocation11], %s3828_s11  ;;  %s3974_s11 = sshll.u32 %s5042_s25, 9 }
 0xb79   : > { %s3706_s13 = sshll.u32 %s489_s18, 4  ;;  %s5831_s9 = scalar_lea.hbm %s5918_s14, %s3974_s11  ;;  %s5825_s13 = int_to_ptr.vmem [resolvable:$true] %s3706_s13 }
 0xb7a   : > { %s4858_s27 = scalar_lea.vmem %s5825_s13, 512  ;;  %s4953_s25 = smov [#allocation11]  }
 0xb7b   : > { %p4859_p3 = scmp.ne.s32.totalorder %s5825_s13, %s4858_s27  ;;  %s4862_s29 = sshll.u32 %s4953_s25, 4  ;;  %s4863_s29 = int_to_ptr.vmem [resolvable:$false] %s4862_s29 }
 0xb7c   : > { %4466 = vrot.lane.b32.xlu1 %v4465_v27, %s4951_s3  ;;  %s5917_s3 = sld [smem:[#allocation20_spill]]  ;;  %p4865_p12 = scmp.lt.s32.totalorder %s5825_s13, %s4863_s29 }
 0xb7d   : > { %p4860_p5 = pnand %p4859_p3, %p5177_p10 }
 0xb7e   : > { %v2381_v44 = vpop.xlane.xlu0 %2380 }
 0xb7f   : > { %4664 = vrcp.f32 %v2381_v44  ;;  %p4861_p7 = pneg %p4860_p5 }
 0xb86   : > { %v2387_v34 = vpop.xlane.xlu0 %2386 }
 0xb87   : > { %4666 = vrcp.f32 %v2387_v34 }
 0xb89   : > { %v4665_v12 = vpop.eup %4664 }
 0xb8a   : > { %v2395_v13 = vmul.f32 %v4665_v12, %v4657_v59  ;;  %v2404_v15 = vpop.permute.xlu0 %2403 }
 0xb8b   : > { %v2409_v17 = vsel %vm1081_vm2, %v2404_v15, 0 }
 0xb8c   : > { %4304 = vmatpush3.bf16.msra.mxu1 %v2409_v17  ;;  %v2399_v18 = vpack.c.bf16 %v2395_v13, %v2395_v13 }
 0xb8d   : > { %4315 = vmatprep.subr.bf16.mxu1 %v4948_v14 }
 0xb8e   : > { %v4452_v1 = vpop.permute.xlu0 %4451 }
 0xb8f   : > { %4306 = vmatmul.mubr.msk.bf16.vlgmr.msra.gmra.mrb[56].mxu1 %vm1029_vm3, %v2399_v18  ;;  %v4453_v6 = vunpack.i.l.bf16 %v4452_v1 }
 0xb90   : > { %4317 = vmatprep.mubr.msk.bf16.mxu1 %vm4949_vm0, %v4948_v14 }
 0xb91   : > { %v4667_v4 = vpop.eup %4666  ;;  %v2643_v11 = vsel %vm844_vm1, %v5415_v3, %v4453_v6 }
 0xb92   : > { %v2397_v20 = vmul.f32 %v4667_v4, %v4659_v61  ;;  %v4462_v2 = vpop.permute.xlu0 %4461 }
 0xb93   : > { %v4464_v36 = vunpack.i.h.bf16 %v4462_v2  ;;  %v4463_v9 = vunpack.i.l.bf16 %v4462_v2 }
 0xb94   : > { %v2401_v25 = vpack.c.bf16 %v2397_v20, %v2397_v20 }
 0xb95   : > { %v2648_v12 = vsel %vm2647_vm4, %v2643_v11, %v4463_v9 }
 0xbb7   : > { %v2384_v19 = vpop.xlane.xlu1 %2383 }
 0xbb8   : > { %4668 = vrcp.f32 %v2384_v19 }
 0xbbb   : > { %v2452_v33 = vpop.permute.xlu1 %2451 }
 0xbbc   : > { %v2457_v35 = vsel %vm1081_vm2, %v2452_v33, 0 }
 0xbbd   : > { %4310 = vmatpush3.bf16.msra.mxu0 %v2457_v35 }
 0xbbe   : > { %4321 = vmatprep.subr.bf16.mxu0 %v4948_v14 }
 0xbbf   : > { %v2500_v21 = vpop.permute.xlu1 %2499 }
 0xbc0   : > { %v2505_v22 = vsel %vm1081_vm2, %v2500_v21, 0 }
 0xbc1   : > { %4316 = vmatpush3.bf16.msra.mxu1 %v2505_v22 }
 0xbc2   : > { %v4669_v16 = vpop.eup %4668  ;;  %4327 = vmatprep.subr.bf16.mxu1 %v4512_v42 }
 0xbc3   : > { %v2396_v28 = vmul.f32 %v4669_v16, %v4661_v5  ;;  %v4454_v5 = vunpack.i.h.bf16 %v4452_v1 }
 0xbc4   : > { %4318 = vmatmul.mubr.msk.bf16.vlgmr.msra.gmra.mrb[60].mxu1 %vm1029_vm3, %v2401_v25 }
 0xbc5   : > { %v2400_v29 = vpack.c.bf16 %v2396_v28, %v2396_v28  ;;  %4328 = vmatpush3.bf16.msra.mxu1 %v4512_v42 }
 0xbc6   : > { %4329 = vmatprep.subr.bf16.mxu1 %v4513_v43 }
 0xbc7   : > { %4312 = vmatmul.mubr.msk.bf16.vlgmr.msra.gmra.mrb[68].mxu0 %vm1029_vm3, %v2400_v29 }
 0xbc8   : > { %4323 = vmatprep.mubr.msk.bf16.mxu0 %vm4949_vm0, %v4948_v14 }
 0xbc9   : > { %4330 = vmatpush3.bf16.msra.mxu1 %v4513_v43  ;;  %v4713_v43 = vld [vmem:[%s5235_s26 + $0x8] sm:$0xff] }
 0xbca   : > { %4331 = vmatprep.subr.bf16.mxu1 %v4514_v48 }
 0xbcd   : > { %4332 = vmatpush3.bf16.msra.mxu1 %v4514_v48 }
 0xbce   : > { %4333 = vmatprep.subr.bf16.mxu1 %v4515_v23 }
 0xbd1   : > { %4334 = vmatpush3.bf16.msra.mxu1 %v4515_v23  ;;  %v4528_v23 = vld [vmem:[#allocation8 + $0x24] ss:$16 sps:$4 sm:$0xff]  }
 0xbd2   : > { %4335 = vmatprep.subr.bf16.mxu1 %v4516_v55 }
 0xbd5   : > { %4336 = vmatpush3.bf16.msra.mxu1 %v4516_v55  ;;  %v4531_v55 = vld [vmem:[#allocation8 + $0x2c] ss:$16 sps:$4 sm:$0xff]  }
 0xbd6   : > { %4337 = vmatprep.subr.bf16.mxu1 %v4517_v56 }
 0xbd9   : > { %4338 = vmatpush3.bf16.msra.mxu1 %v4517_v56  ;;  %v4526_v56 = vld [vmem:[#allocation8 + $0x20] ss:$16 sps:$4 sm:$0xff]  }
 0xbda   : > { %4339 = vmatprep.subr.bf16.mxu1 %v4518_v57 }
 0xbdd   : > { %4340 = vmatpush3.bf16.msra.mxu1 %v4518_v57  ;;  %v4529_v57 = vld [vmem:[#allocation8 + $0x28] ss:$16 sps:$4 sm:$0xff]  }
 0xbde   : > { %4341 = vmatprep.subr.bf16.mxu1 %v4519_v58 }
 0xbe1   : > { %4342 = vmatpush3.bf16.msra.mxu1 %v4519_v58 }
 0xbf0   : > { %v2390_v40 = vpop.xlane.xlu1 %2389 }
 0xbf1   : > { %4670 = vrcp.f32 %v2390_v40 }
 0xbf4   : > { %v2548_v24 = vpop.permute.xlu1 %2547 }
 0xbf5   : > { %v2553_v26 = vsel %vm1081_vm2, %v2548_v24, 0 }
 0xbf6   : > { %4322 = vmatpush3.bf16.msra.mxu0 %v2553_v26 }
 0xbf8   : > { %v4457_v19 = vpop.permute.xlu1 %4456 }
 0xbf9   : > { %v4459_v33 = vunpack.i.h.bf16 %v4457_v19  ;;  %v4458_v35 = vunpack.i.l.bf16 %v4457_v19  ;;  %v4538_v19 = vld [vmem:[#allocation8 + $0x60] ss:$16 sps:$4 sm:$0xff]  }
 0xbfb   : > { %v4671_v38 = vpop.eup %4670  ;;  %v2646_v3 = vsel %vm844_vm1, %v5423_v32, %v4459_v33  ;;  %v2645_v22 = vsel %vm844_vm1, %v5417_v7, %v4458_v35  ;;  %v3892_v7 = vld [vmem:[%s5881_s5] ss:$0 sm:$0xff]  ;;  %v4546_v33 = vld [vmem:[#allocation8 + $0x84] ss:$16 sps:$4 sm:$0xff]   ;;  %v4549_v35 = vld [vmem:[#allocation8 + $0x8c] ss:$16 sps:$4 sm:$0xff]  }
 0xbfc   : > { %v2398_v37 = vmul.f32 %v4671_v38, %v4663_v10  ;;  %v2644_v10 = vsel %vm844_vm1, %v5419_v8, %v4454_v5  ;;  %v4467_v4 = vpop.permute.xlu1 %4466 }
 0xbfd   : > { %v2649_v13 = vsel %vm2647_vm4, %v2644_v10, %v4464_v36  ;;  %v4469_v8 = vunpack.i.h.bf16 %v4467_v4  ;;  %v4468_v20 = vunpack.i.l.bf16 %v4467_v4  ;;  %v4541_v4 = vld [vmem:[#allocation8 + $0x68] ss:$16 sps:$4 sm:$0xff]  }
 0xbfe   : > { %v2402_v45 = vpack.c.bf16 %v2398_v37, %v2398_v37 }
 0xbff   : > { %v2650_v28 = vsel %vm2647_vm4, %v2645_v22, %v4468_v20  ;;  %v2651_v29 = vsel %vm2647_vm4, %v2646_v3, %v4469_v8  ;;  %v4544_v8 = vld [vmem:[#allocation8 + $0x80] ss:$16 sps:$4 sm:$0xff]   ;;  %v4547_v20 = vld [vmem:[#allocation8 + $0x88] ss:$16 sps:$4 sm:$0xff]   ;;  %v4555_v3 = vld [vmem:[#allocation8 + $0xac] ss:$16 sps:$4 sm:$0xff]  }
 0xc00   : > { %4324 = vmatmul.mubr.msk.bf16.vlgmr.msra.gmra.mrb[72].mxu0 %vm1029_vm3, %v2402_v45  ;;  %v4550_v22 = vld [vmem:[#allocation8 + $0xa0] ss:$16 sps:$4 sm:$0xff]  }
 0xc01   : > { %3097 = vmatprep.mubr.bf16.mxu0 %v4947_v39 }
 0xc62   : > { %v2445_v27 = vpop.f32.mrb[56].mxu1 }
 0xc63   : > { %v4307_v30 = vpop.f32.mrb[57].mxu1 }
 0xc64   : > { %v2448_v31 = vpop.f32.mrb[58].mxu1 }
 0xc65   : > { %v4308_v41 = vpop.f32.mrb[59].mxu1  ;;  %v4712_v31 = vld [vmem:[%s5235_s26] sm:$0xff] }
 0xc97   : > { %v2541_v14 = vpop.f32.mrb[60].mxu1 }
 0xc98   : > { %v4319_v46 = vpop.f32.mrb[61].mxu1 }
 0xc99   : > { %v2544_v47 = vpop.f32.mrb[62].mxu1  ;;  %v4714_v46 = vld [vmem:[%s5235_s26 + $0x10] sm:$0xff] }
 0xc9a   : > { %v2493_v49 = vpop.f32.mrb[68].mxu0  ;;  %v4320_v50 = vpop.f32.mrb[63].mxu1 }
 0xc9b   : > { %v4470_v51 = vpack.i.bf16 %v2493_v49, %v2445_v27  ;;  %v4313_v52 = vpop.f32.mrb[69].mxu0  ;;  %v4715_v49 = vld [vmem:[%s5235_s26 + $0x18] sm:$0xff]  ;;  %s3693_s26 = scalar_lea.sflag [#allocation4], %s5229_s15 }
 0xc9c   : > { %v2496_v53 = vpop.f32.mrb[70].mxu0  ;;  %v4522_v52 = vld [vmem:[#allocation8 + $0x4] ss:$16 sps:$4 sm:$0xff]  }
 0xc9d   : > { %4471 = vrot.lane.b32.xlu0 %v4470_v51, %s4950_s28  ;;  %v4314_v54 = vpop.f32.mrb[71].mxu0  ;;  %v4520_v51 = vld [vmem:[#allocation8] ss:$16 sps:$4 sm:$0xff]   ;;  %v4523_v53 = vld [vmem:[#allocation8 + $0x8] ss:$16 sps:$4 sm:$0xff]   ;;  %3065 = vmatprep.subr.bf16.mxu0 %v4522_v52 }
 0xc9e   : > { %v4525_v54 = vld [vmem:[#allocation8 + $0xc] ss:$16 sps:$4 sm:$0xff]   ;;  %3066 = vmatpush1.bf16.msra.mxu0 %v4520_v51 }
 0xc9f   : > { %3118 = vmatprep.subr.bf16.mxu1 %v4525_v54  ;;  %3067 = vmatprep.subr.bf16.mxu0 %v4528_v23 }
 0xca2   : > { %3068 = vmatpush1.bf16.msra.mxu0 %v4526_v56 }
 0xcd3   : > { %v2589_v59 = vpop.f32.mrb[72].mxu0 }
 0xcd4   : > { %v4475_v60 = vpack.i.bf16 %v2589_v59, %v2541_v14  ;;  %v4325_v61 = vpop.f32.mrb[73].mxu0 }
 0xcd5   : > { %v2592_v62 = vpop.f32.mrb[74].mxu0 }
 0xcd6   : > { %4476 = vrot.lane.b32.xlu1 %v4475_v60, %s4950_s28  ;;  %v4326_v0 = vpop.f32.mrb[75].mxu0 }
 0xd0f   : > { %v4472_v63 = vpop.permute.xlu0 %4471 }
 0xd10   : > { %v4474_v44 = vunpack.i.h.bf16 %v4472_v63  ;;  %v4473_v34 = vunpack.i.l.bf16 %v4472_v63 }
 0xd12   : > { %v2653_v15 = vsel %vm2652_vm5, %v2648_v12, %v4473_v34  ;;  %v2654_v17 = vsel %vm2652_vm5, %v2649_v13, %v4474_v44  ;;  %v4534_v34 = vld [vmem:[#allocation8 + $0x44] ss:$16 sps:$4 sm:$0xff]   ;;  %v4537_v12 = vld [vmem:[#allocation8 + $0x4c] ss:$16 sps:$4 sm:$0xff]   ;;  %v4532_v13 = vld [vmem:[#allocation8 + $0x40] ss:$16 sps:$4 sm:$0xff]  }
 0xd13   : > { %v2657_v18 = vpack.c.bf16 %v2654_v17, %v2653_v15  ;;  %v4535_v15 = vld [vmem:[#allocation8 + $0x48] ss:$16 sps:$4 sm:$0xff]   ;;  %3069 = vmatprep.subr.bf16.mxu0 %v4534_v34  ;;  %v4540_v17 = vld [vmem:[#allocation8 + $0x64] ss:$16 sps:$4 sm:$0xff]  }
 0xd14   : > { %3070 = vmatpush1.bf16.msra.mxu0 %v4532_v13  ;;  %v4569_v34 = vld [vmem:[#allocation10 + $0xc0] sm:$0xff]   ;;  %v4573_v13 = vld [vmem:[#allocation10 + $0xc8] sm:$0xff]  }
 0xd15   : > { %4343 = vmatprep.mubr.bf16.mxu1 %v2657_v18  ;;  %v4543_v18 = vld [vmem:[#allocation8 + $0x6c] ss:$16 sps:$4 sm:$0xff]   ;;  %3071 = vmatprep.subr.bf16.mxu0 %v4540_v17 }
 0xd16   : > { %v4575_v17 = vld [vmem:[#allocation10 + $0x88] sm:$0xff]  }
 0xd18   : > { %3072 = vmatpush1.bf16.msra.mxu0 %v4538_v19  ;;  %v4578_v19 = vld [vmem:[#allocation10 + $0x10] sm:$0xff]  }
 0xd19   : > { %3073 = vmatprep.subr.bf16.mxu0 %v4546_v33  ;;  %v4580_v33 = vld [vmem:[#allocation10 + $0x58] sm:$0xff]  }
 0xd1c   : > { %3074 = vmatpush1.bf16.msra.mxu0 %v4544_v8  ;;  %v4582_v8 = vld [vmem:[#allocation10 + $0x18] sm:$0xff]  }
 0xd48   : > { %v4477_v21 = vpop.permute.xlu1 %4476 }
 0xd49   : > { %v4479_v16 = vunpack.i.h.bf16 %v4477_v21  ;;  %v4478_v25 = vunpack.i.l.bf16 %v4477_v21  ;;  %v4552_v21 = vld [vmem:[#allocation8 + $0xa4] ss:$16 sps:$4 sm:$0xff]  }
 0xd4a   : > { %3075 = vmatprep.subr.bf16.mxu0 %v4552_v21  ;;  %v4584_v21 = vld [vmem:[#allocation10 + $0x60] sm:$0xff]  }
 0xd4b   : > { %v2656_v40 = vsel %vm2652_vm5, %v2651_v29, %v4479_v16  ;;  %v2655_v24 = vsel %vm2652_vm5, %v2650_v28, %v4478_v25  ;;  %v4553_v16 = vld [vmem:[#allocation8 + $0xa8] ss:$16 sps:$4 sm:$0xff]   ;;  %3076 = vmatpush1.bf16.msra.mxu0 %v4550_v22  ;;  %v4558_v25 = vld [vmem:[#allocation8 + $0xc4] ss:$16 sps:$4 sm:$0xff]   ;;  %v4561_v28 = vld [vmem:[#allocation8 + $0xcc] ss:$16 sps:$4 sm:$0xff]  }
 0xd4c   : > { %v2658_v26 = vpack.c.bf16 %v2656_v40, %v2655_v24  ;;  %v4556_v29 = vld [vmem:[#allocation8 + $0xc0] ss:$16 sps:$4 sm:$0xff]   ;;  %v4559_v40 = vld [vmem:[#allocation8 + $0xc8] ss:$16 sps:$4 sm:$0xff]   ;;  %3077 = vmatprep.subr.bf16.mxu0 %v4558_v25  ;;  %v4564_v24 = vld [vmem:[#allocation8 + $0xe4] ss:$16 sps:$4 sm:$0xff]  }
 0xd4d   : > { %v4586_v22 = vld [vmem:[#allocation10 + $0x20] sm:$0xff]   ;;  %v4588_v25 = vld [vmem:[#allocation10 + $0x68] sm:$0xff]  }
 0xd4e   : > { %4344 = vmatmul.mubr.bf16.vlgmr.msra.gmra.mrb[64].mxu1 %v2658_v26  ;;  %v4567_v26 = vld [vmem:[#allocation8 + $0xec] ss:$16 sps:$4 sm:$0xff]  }
 0xd4f   : > { %3150 = vmatprep.mubr.bf16.mxu1 %v4947_v39  ;;  %3119 = vmatpush1.bf16.msra.mxu1 %v4523_v53  ;;  %v3901_v53 = vld [vmem:[%s5882_s6] ss:$0 sm:$0xff] }
 0xd50   : > { %3120 = vmatprep.subr.bf16.mxu1 %v4531_v55  ;;  %3078 = vmatpush1.bf16.msra.mxu0 %v4556_v29  ;;  %v4590_v29 = vld [vmem:[#allocation10 + $0x28] sm:$0xff]  }
 0xd51   : > { %3079 = vmatprep.subr.bf16.mxu0 %v4564_v24  ;;  %v4592_v24 = vld [vmem:[#allocation10 + $0x70] sm:$0xff]  }
 0xd53   : > { %3121 = vmatpush1.bf16.msra.mxu1 %v4529_v57 }
 0xd54   : > { %3122 = vmatprep.subr.bf16.mxu1 %v4537_v12  ;;  %v4571_v12 = vld [vmem:[#allocation10 + $0x80] sm:$0xff]  }
 0xd57   : > { %3123 = vmatpush1.bf16.msra.mxu1 %v4535_v15  ;;  %v4574_v15 = vld [vmem:[#allocation10 + $0x8] sm:$0xff]  }
 0xd58   : > { %3124 = vmatprep.subr.bf16.mxu1 %v4543_v18  ;;  %v4577_v18 = vld [vmem:[#allocation10 + $0xd0] sm:$0xff]  }
 0xd5b   : > { %3125 = vmatpush1.bf16.msra.mxu1 %v4541_v4  ;;  %v4579_v4 = vld [vmem:[#allocation10 + $0x90] sm:$0xff]  }
 0xd5c   : > { %3126 = vmatprep.subr.bf16.mxu1 %v4549_v35  ;;  %v4581_v35 = vld [vmem:[#allocation10 + $0xd8] sm:$0xff]  }
 0xd5f   : > { %3127 = vmatpush1.bf16.msra.mxu1 %v4547_v20  ;;  %v4583_v20 = vld [vmem:[#allocation10 + $0x98] sm:$0xff]  }
 0xd60   : > { %3128 = vmatprep.subr.bf16.mxu1 %v4555_v3  ;;  %v4585_v3 = vld [vmem:[#allocation10 + $0xe0] sm:$0xff]  }
 0xd63   : > { %3129 = vmatpush1.bf16.msra.mxu1 %v4553_v16  ;;  %v4587_v16 = vld [vmem:[#allocation10 + $0xa0] sm:$0xff]  }
 0xd64   : > { %3130 = vmatprep.subr.bf16.mxu1 %v4561_v28  ;;  %v4589_v28 = vld [vmem:[#allocation10 + $0xe8] sm:$0xff]  }
 0xd67   : > { %3131 = vmatpush1.bf16.msra.mxu1 %v4559_v40  ;;  %v4591_v40 = vld [vmem:[#allocation10 + $0xa8] sm:$0xff]  }
 0xd68   : > { %3132 = vmatprep.subr.bf16.mxu1 %v4567_v26  ;;  %v4593_v26 = vld [vmem:[#allocation10 + $0xf0] sm:$0xff]  }
 0xe21   : > { %v4345_v32 = vpop.f32.mrb[64].mxu1 }
 0xe22   : > { %v2764_v38 = vpop.f32.mrb[65].mxu1  ;;  %v2773_v30 = vadd.f32 %v4345_v32, %v3892_v7  ;;  %v4565_v32 = vld [vmem:[#allocation8 + $0xe8] ss:$16 sps:$4 sm:$0xff]  }
 0xe23   : > { %v2765_v37 = vadd.f32 %v3892_v7, %v2764_v38  ;;  %v4346_v45 = vpop.f32.mrb[66].mxu1  ;;  %3133 = vmatpush1.bf16.msra.mxu1 %v4565_v32  ;;  %v4595_v32 = vld [vmem:[#allocation10 + $0xb0] sm:$0xff]  }
 0xe24   : > { %v2767_v27 = vpop.f32.mrb[67].mxu1  ;;  %v5653_v47 = vadd.f32 %v4714_v46, %v2773_v30  ;;  %v2776_v48 = vadd.f32 %v4346_v45, %v3892_v7  ;;  %4087 = vmatprep.subr.bf16.mxu1 %v4569_v34 }
 0xe25   : > { %v5646_v41 = vadd.f32 %v4712_v31, %v2765_v37  ;;  %v2768_v42 = vadd.f32 %v3892_v7, %v2767_v27  ;;  %v4562_v7 = vld [vmem:[#allocation8 + $0xe0] ss:$16 sps:$4 sm:$0xff]  }
 0xe26   : > { %v5658_v50 = vadd.f32 %v4715_v49, %v2776_v48  ;;  %3080 = vmatpush1.bf16.msra.mxu0 %v4562_v7  ;;  %v4594_v7 = vld [vmem:[#allocation10 + $0x30] sm:$0xff]  }
 0xe27   : > { %v5649_v14 = vadd.f32 %v4713_v43, %v2768_v42  ;;  %2785 = vadd.xlane.f32.xlu0 %v5646_v41 }
 0xe29   : > { %2787 = vadd.xlane.f32.xlu1 %v5649_v14 }
 0xe2b   : > { %2789 = vadd.xlane.f32.xlu0 %v5653_v47 }
 0xe2f   : > { %2791 = vadd.xlane.f32.xlu0 %v5658_v50 }
 0xeb4   : > { %v2786_v58 = vpop.xlane.xlu0 %2785 }
 0xeb5   : > { %v2793_v59 = vmul.f32 0.0078125, %v2786_v58  ;;  %v3902_v58 = vld [vmem:[%s5883_s7] ss:$0 sm:$0xff] }
 0xeb6   : > { %v2788_v60 = vpop.xlane.xlu1 %2787 }
 0xeb7   : > { %v5662_v61 = vsub.f32 %v5646_v41, %v2793_v59  ;;  %v2794_v62 = vmul.f32 0.0078125, %v2788_v60 }
 0xeb8   : > { %v2790_v0 = vpop.xlane.xlu0 %2789 }
 0xeb9   : > { %v5665_v1 = vsub.f32 %v5649_v14, %v2794_v62  ;;  %v2795_v2 = vmul.f32 0.0078125, %v2790_v0  ;;  %v2801_v5 = vmul.f32 %v5662_v61, %v5662_v61 }
 0xebb   : > { %v5670_v6 = vsub.f32 %v5653_v47, %v2795_v2  ;;  %2805 = vadd.xlane.f32.xlu0 %v2801_v5  ;;  %v2802_v36 = vmul.f32 %v5665_v1, %v5665_v1 }
 0xebc   : > { %v2792_v9 = vpop.xlane.xlu0 %2791 }
 0xebd   : > { %v2796_v63 = vmul.f32 0.0078125, %v2792_v9  ;;  %2807 = vadd.xlane.f32.xlu1 %v2802_v36  ;;  %v2803_v10 = vmul.f32 %v5670_v6, %v5670_v6 }
 0xebf   : > { %v5677_v11 = vsub.f32 %v5658_v50, %v2796_v63  ;;  %2809 = vadd.xlane.f32.xlu0 %v2803_v10 }
 0xec1   : > { %v2804_v44 = vmul.f32 %v5677_v11, %v5677_v11 }
 0xec3   : > { %2811 = vadd.xlane.f32.xlu1 %v2804_v44  ;;  %v4568_v44 = vld [vmem:[#allocation10 + $0x40] sm:$0xff]  }
 0xec4   : > { %4059 = vmatprep.subr.bf16.mxu0 %v4568_v44 }
 0xf48   : > { %v2806_v38 = vpop.xlane.xlu0 %2805 }
 0xf49   : > { %v2813_v37 = vmul.f32 0.0078125, %v2806_v38  ;;  %v4596_v38 = vld [vmem:[#allocation10 + $0x78] sm:$0xff]  }
 0xf4a   : > { %v2808_v45 = vpop.xlane.xlu1 %2807 }
 0xf4b   : > { %v2817_v27 = vadd.f32 1e-05, %v2813_v37  ;;  %v2814_v30 = vmul.f32 0.0078125, %v2808_v45  ;;  %v4597_v37 = vld [vmem:[#allocation10 + $0xf8] sm:$0xff]  }
 0xf4c   : > { %v2810_v31 = vpop.xlane.xlu0 %2809  ;;  %v4598_v45 = vld [vmem:[#allocation10 + $0x38] sm:$0xff]  }
 0xf4d   : > { %4672 = vrsqrt.f32 %v2817_v27  ;;  %v2818_v42 = vadd.f32 1e-05, %v2814_v30  ;;  %v2815_v43 = vmul.f32 0.0078125, %v2810_v31  ;;  %v4599_v27 = vld [vmem:[#allocation10 + $0xb8] sm:$0xff]   ;;  %v2885_v30 = vlaneseq }
 0xf4f   : > { %4674 = vrsqrt.f32 %v2818_v42  ;;  %v2819_v46 = vadd.f32 1e-05, %v2815_v43  ;;  %v2886_v31 = vshrl.u32 %v2885_v30, 7 }
 0xf50   : > { %v2812_v48 = vpop.xlane.xlu1 %2811 }
 0xf51   : > { %4676 = vrsqrt.f32 %v2819_v46  ;;  %v2816_v49 = vmul.f32 0.0078125, %v2812_v48  ;;  %v2887_v42 = vsub.s32 0, %v2886_v31  ;;  %v2895_v43 = vsub.s32 2, %v2886_v31  ;;  %v2883_v46 = vld [vmem:[%s5916_s17] sm:$0xf]  ;;  %s4864_s17 = scalar_lea.vmem %s4863_s29, 1024 }
 0xf52   : > { %v2891_v48 = vsub.s32 1, %v2886_v31  ;;  %p4866_p2 = scmp.lt.s32.totalorder %s4864_s17, %s4858_s27 }
 0xf53   : > { %v2820_v51 = vadd.f32 1e-05, %v2816_v49  ;;  %v5696_v49 = vrot.slane %v2883_v46, %v2887_v42 }
 0xf54   : > { %p4867_p1 = por %p4866_p2, %p4865_p12 }
 0xf55   : > { %4678 = vrsqrt.f32 %v2820_v51  ;;  %v5698_v51 = vrot.slane %v2883_v46, %v2895_v43 }
 0xf56   : > { %p4868_p13 = pnand %p4867_p1, %p4861_p7 }
 0xf57   : > { %v4673_v52 = vpop.eup %4672 }
 0xf58   : > { %v2825_v54 = vmul.f32 %v4673_v52, %v5662_v61  ;;  %v2899_v52 = vsub.s32 3, %v2886_v31 }
 0xf59   : > { %v4675_v23 = vpop.eup %4674 }
 0xf5a   : > { %v2826_v55 = vmul.f32 %v4675_v23, %v5665_v1  ;;  %v2835_v56 = vmul.f32 %v3901_v53, %v2825_v54  ;;  %v5700_v23 = vrot.slane %v2883_v46, %v2891_v48 }
 0xf5b   : > { %v4677_v57 = vpop.eup %4676 }
 0xf5c   : > { %v2836_v59 = vmul.f32 %v3901_v53, %v2826_v55  ;;  %v2845_v60 = vadd.f32 %v3902_v58, %v2835_v56  ;;  %v2827_v0 = vmul.f32 %v4677_v57, %v5670_v6  ;;  %v4570_v6 = vld [vmem:[#allocation10] sm:$0xff]  }
 0xf5e   : > { %v2846_v62 = vadd.f32 %v3902_v58, %v2836_v59  ;;  %v2837_v61 = vmul.f32 %v3901_v53, %v2827_v0  ;;  %v5704_v59 = vrot.slane %v2883_v46, %v2899_v52 }
 0xf5f   : > { %v4679_v2 = vpop.eup %4678 }
 0xf60   : > { %v2849_v5 = vpack.c.bf16 %v2846_v62, %v2845_v60  ;;  %v2828_v36 = vmul.f32 %v4679_v2, %v5677_v11  ;;  %v2847_v63 = vadd.f32 %v3902_v58, %v2837_v61  ;;  %v4572_v11 = vld [vmem:[#allocation10 + $0x48] sm:$0xff]  }
 0xf62   : > { %3098 = vmatmul.mubr.bf16.vlgmr.msra.gmra.mrb[76].mxu0 %v2849_v5  ;;  %3151 = vmatmul.mubr.bf16.vlgmr.msra.gmra.mrb[68].mxu1 %v2849_v5  ;;  %v2838_v9 = vmul.f32 %v3901_v53, %v2828_v36 }
 0xf63   : > { %3107 = vmatprep.mubr.bf16.mxu0 %v4947_v39  ;;  %3160 = vmatprep.mubr.bf16.mxu1 %v4947_v39  ;;  %v4576_v39 = vld [vmem:[#allocation10 + $0x50] sm:$0xff]  }
 0xf64   : > { %v2848_v1 = vadd.f32 %v3902_v58, %v2838_v9  ;;  %4060 = vmatpush3.bf16.msra.mxu0 %v4570_v6  ;;  %4088 = vmatpush3.bf16.msra.mxu1 %v4571_v12 }
 0xf65   : > { %4061 = vmatprep.subr.bf16.mxu0 %v4572_v11  ;;  %4089 = vmatprep.subr.bf16.mxu1 %v4573_v13 }
 0xf66   : > { %v2850_v10 = vpack.c.bf16 %v2848_v1, %v2847_v63 }
 0xf68   : > { %4062 = vmatpush3.bf16.msra.mxu0 %v4574_v15  ;;  %4090 = vmatpush3.bf16.msra.mxu1 %v4575_v17 }
 0xf69   : > { %4063 = vmatprep.subr.bf16.mxu0 %v4576_v39  ;;  %4091 = vmatprep.subr.bf16.mxu1 %v4577_v18 }
 0xf6a   : > { %3108 = vmatmul.mubr.bf16.gmra.mrb[80].mxu0 %v2850_v10  ;;  %3161 = vmatmul.mubr.bf16.gmra.mrb[72].mxu1 %v2850_v10 }
 0xf6c   : > { %4064 = vmatpush3.bf16.msra.mxu0 %v4578_v19  ;;  %4092 = vmatpush3.bf16.msra.mxu1 %v4579_v4 }
 0xf6d   : > { %4065 = vmatprep.subr.bf16.mxu0 %v4580_v33  ;;  %4093 = vmatprep.subr.bf16.mxu1 %v4581_v35 }
 0xf70   : > { %4066 = vmatpush3.bf16.msra.mxu0 %v4582_v8  ;;  %4094 = vmatpush3.bf16.msra.mxu1 %v4583_v20 }
 0xf71   : > { %4067 = vmatprep.subr.bf16.mxu0 %v4584_v21  ;;  %4095 = vmatprep.subr.bf16.mxu1 %v4585_v3 }
 0xf74   : > { %4068 = vmatpush3.bf16.msra.mxu0 %v4586_v22  ;;  %4096 = vmatpush3.bf16.msra.mxu1 %v4587_v16 }
 0xf75   : > { %4069 = vmatprep.subr.bf16.mxu0 %v4588_v25  ;;  %4097 = vmatprep.subr.bf16.mxu1 %v4589_v28 }
 0xf78   : > { %4070 = vmatpush3.bf16.msra.mxu0 %v4590_v29  ;;  %4098 = vmatpush3.bf16.msra.mxu1 %v4591_v40 }
 0xf79   : > { %4071 = vmatprep.subr.bf16.mxu0 %v4592_v24  ;;  %4099 = vmatprep.subr.bf16.mxu1 %v4593_v26 }
 0xf7c   : > { %4072 = vmatpush3.bf16.msra.mxu0 %v4594_v7  ;;  %4100 = vmatpush3.bf16.msra.mxu1 %v4595_v32 }
 0xf7d   : > { %4073 = vmatprep.subr.bf16.mxu0 %v4596_v38  ;;  %4101 = vmatprep.subr.bf16.mxu1 %v4597_v37 }
 0xf80   : > { %4074 = vmatpush3.bf16.msra.mxu0 %v4598_v45  ;;  %4102 = vmatpush3.bf16.msra.mxu1 %v4599_v27 }
0x1035   : > { %v3099_v53 = vpop.f32.mrb[76].mxu0  ;;  %v3152_v54 = vpop.f32.mrb[68].mxu1 }
0x1036   : > { %v3100_v55 = vadd.f32 %v3099_v53, %v5696_v49  ;;  %v3153_v56 = vadd.f32 %v3152_v54, %v5698_v51  ;;  %v3101_v57 = vpop.f32.mrb[77].mxu0  ;;  %v3154_v58 = vpop.f32.mrb[69].mxu1 }
0x1037   : > { %v3103_v60 = vpop.f32.mrb[78].mxu0  ;;  %v3156_v62 = vpop.f32.mrb[70].mxu1  ;;  %v5707_v5 = vadd.f32 %v3101_v57, %v5700_v23  ;;  %v5717_v34 = vadd.f32 %v3154_v58, %v5704_v59 }
0x1038   : > { %v3187_v0 = vmul.f32 0.044715, %v3100_v55  ;;  %v3189_v2 = vmul.f32 0.044715, %v3153_v56  ;;  %v3104_v36 = vadd.f32 %v3103_v60, %v5696_v49  ;;  %v5711_v61 = vadd.f32 %v3156_v62, %v5698_v51  ;;  %v3105_v9 = vpop.f32.mrb[79].mxu0  ;;  %v3158_v1 = vpop.f32.mrb[71].mxu1 }
0x1039   : > { %v5714_v44 = vadd.f32 %v3105_v9, %v5700_v23  ;;  %v5720_v12 = vadd.f32 %v3158_v1, %v5704_v59  ;;  %v5722_v11 = vmul.f32 0.5, %v3100_v55  ;;  %v3188_v39 = vmul.f32 0.044715, %v5707_v5 }
0x103a   : > { %v3203_v63 = vmul.f32 %v3187_v0, %v3100_v55  ;;  %v3205_v10 = vmul.f32 %v3189_v2, %v3153_v56  ;;  %v3191_v6 = vmul.f32 0.044715, %v3104_v36  ;;  %v3193_v17 = vmul.f32 0.044715, %v5711_v61 }
0x103b   : > { %v3192_v19 = vmul.f32 0.044715, %v5714_v44  ;;  %v5727_v8 = vmul.f32 0.5, %v3153_v56  ;;  %v3190_v16 = vmul.f32 0.044715, %v5717_v34  ;;  %v3204_v45 = vmul.f32 %v3188_v39, %v5707_v5 }
0x103c   : > { %v3219_v13 = vmul.f32 %v3203_v63, %v3100_v55  ;;  %v3221_v15 = vmul.f32 %v3205_v10, %v3153_v56  ;;  %v3207_v18 = vmul.f32 %v3191_v6, %v3104_v36  ;;  %v3209_v21 = vmul.f32 %v3193_v17, %v5711_v61 }
0x103d   : > { %v3109_v4 = vpop.f32.mrb[80].mxu0  ;;  %v3162_v33 = vpop.f32.mrb[72].mxu1  ;;  %v3194_v28 = vmul.f32 0.044715, %v5720_v12  ;;  %v3208_v30 = vmul.f32 %v3192_v19, %v5714_v44  ;;  %v3206_v48 = vmul.f32 %v3190_v16, %v5717_v34  ;;  %v3220_v58 = vmul.f32 %v3204_v45, %v5707_v5 }
0x103e   : > { %v3235_v35 = vadd.f32 %v3219_v13, %v3100_v55  ;;  %v3237_v20 = vadd.f32 %v3221_v15, %v3153_v56  ;;  %v3111_v3 = vpop.f32.mrb[81].mxu0  ;;  %v3164_v22 = vpop.f32.mrb[73].mxu1  ;;  %v3223_v25 = vmul.f32 %v3207_v18, %v3104_v36  ;;  %v5733_v29 = vadd.f32 %v3109_v4, %v5696_v49 }
0x103f   : > { %v3113_v40 = vpop.f32.mrb[82].mxu0  ;;  %v3166_v24 = vpop.f32.mrb[74].mxu1  ;;  %v3225_v32 = vmul.f32 %v3209_v21, %v5711_v61  ;;  %v5739_v31 = vadd.f32 %v3162_v33, %v5698_v51  ;;  %v5744_v46 = vadd.f32 %v3111_v3, %v5700_v23  ;;  %v3210_v53 = vmul.f32 %v3194_v28, %v5720_v12 }
0x1040   : > { %v3251_v26 = vmul.f32 0.7978846, %v3235_v35  ;;  %v3253_v7 = vmul.f32 0.7978846, %v3237_v20  ;;  %v3115_v38 = vpop.f32.mrb[83].mxu0  ;;  %v3168_v37 = vpop.f32.mrb[75].mxu1  ;;  %v3239_v27 = vadd.f32 %v3223_v25, %v3104_v36  ;;  %v5750_v56 = vadd.f32 %v3164_v22, %v5704_v59 }
0x1041   : > { %v3241_v42 = vadd.f32 %v3225_v32, %v5711_v61  ;;  %v3195_v43 = vmul.f32 0.044715, %v5733_v29  ;;  %v3196_v55 = vmul.f32 0.044715, %v5744_v46  ;;  %v5753_v57 = vadd.f32 %v3113_v40, %v5696_v49 }
0x1042   : > { %4680 = vtanh.f32 %v3251_v26  ;;  %v3255_v52 = vmul.f32 0.7978846, %v3239_v27  ;;  %v3224_v60 = vmul.f32 %v3208_v30, %v5714_v44  ;;  %v5758_v62 = vadd.f32 %v3166_v24, %v5698_v51 }
0x1043   : > { %4682 = vtanh.f32 %v3253_v7  ;;  %v3257_v54 = vmul.f32 0.7978846, %v3241_v42  ;;  %v3211_v0 = vmul.f32 %v3195_v43, %v5733_v29  ;;  %v3197_v2 = vmul.f32 0.044715, %v5739_v31 }
0x1044   : > { %4684 = vtanh.f32 %v3255_v52  ;;  %v3198_v9 = vmul.f32 0.044715, %v5750_v56  ;;  %v3175_v1 = vmul.f32 0.5, %v3104_v36  ;;  %v3212_v63 = vmul.f32 %v3196_v55, %v5744_v46 }
0x1045   : > { %4686 = vtanh.f32 %v3257_v54  ;;  %v5765_v49 = vadd.f32 %v3115_v38, %v5700_v23  ;;  %v5768_v10 = vadd.f32 %v3168_v37, %v5704_v59  ;;  %v3222_v6 = vmul.f32 %v3206_v48, %v5717_v34 }
0x1046   : > { %v3226_v51 = vmul.f32 %v3210_v53, %v5720_v12  ;;  %v3199_v13 = vmul.f32 0.044715, %v5753_v57  ;;  %v3201_v15 = vmul.f32 0.044715, %v5758_v62  ;;  %v3214_v17 = vmul.f32 %v3198_v9, %v5750_v56 }
0x1047   : > { %v3200_v36 = vmul.f32 0.044715, %v5765_v49  ;;  %v3202_v39 = vmul.f32 0.044715, %v5768_v10  ;;  %v3236_v23 = vadd.f32 %v3220_v58, %v5707_v5  ;;  %v3177_v18 = vmul.f32 0.5, %v5711_v61 }
0x1048   : > { %v3227_v59 = vmul.f32 %v3211_v0, %v5733_v29  ;;  %v3213_v19 = vmul.f32 %v3197_v2, %v5739_v31  ;;  %v3240_v4 = vadd.f32 %v3224_v60, %v5714_v44  ;;  %v3228_v33 = vmul.f32 %v3212_v63, %v5744_v46 }
0x1049   : > { %v3216_v35 = vmul.f32 %v3200_v36, %v5765_v49  ;;  %v3218_v20 = vmul.f32 %v3202_v39, %v5768_v10  ;;  %v3252_v21 = vmul.f32 0.7978846, %v3236_v23  ;;  %v3215_v22 = vmul.f32 %v3199_v13, %v5753_v57 }
0x104a   : > { %v3256_v16 = vmul.f32 0.7978846, %v3240_v4  ;;  %v3238_v25 = vadd.f32 %v3222_v6, %v5717_v34  ;;  %v3242_v61 = vadd.f32 %v3226_v51, %v5720_v12  ;;  %v3230_v40 = vmul.f32 %v3214_v17, %v5750_v56 }
0x104b   : > { %v3217_v24 = vmul.f32 %v3201_v15, %v5758_v62  ;;  %v3232_v26 = vmul.f32 %v3216_v35, %v5765_v49  ;;  %4688 = vtanh.f32 %v3252_v21  ;;  %v3229_v45 = vmul.f32 %v3213_v19, %v5739_v31 }
0x104c   : > { %v4681_v3 = vpop.eup %4680  ;;  %4690 = vtanh.f32 %v3256_v16  ;;  %v3254_v7 = vmul.f32 0.7978846, %v3238_v25  ;;  %v3258_v32 = vmul.f32 0.7978846, %v3242_v61  ;;  %v3234_v27 = vmul.f32 %v3218_v20, %v5768_v10 }
0x104d   : > { %v4683_v28 = vpop.eup %4682  ;;  %v3283_v38 = vadd.f32 1.0, %v4681_v3  ;;  %v3244_v42 = vadd.f32 %v3228_v33, %v5744_v46  ;;  %v3231_v48 = vmul.f32 %v3215_v22, %v5753_v57  ;;  %v3248_v53 = vadd.f32 %v3232_v26, %v5765_v49 }
0x104e   : > { %v4685_v37 = vpop.eup %4684  ;;  %v3285_v30 = vadd.f32 1.0, %v4683_v28  ;;  %4692 = vtanh.f32 %v3254_v7  ;;  %v3233_v54 = vmul.f32 %v3217_v24, %v5758_v62  ;;  %v3246_v9 = vadd.f32 %v3230_v40, %v5750_v56 }
0x104f   : > { %v4687_v43 = vpop.eup %4686  ;;  %v3287_v52 = vadd.f32 1.0, %v4685_v37  ;;  %4694 = vtanh.f32 %v3258_v32  ;;  %v3260_v58 = vmul.f32 0.7978846, %v3244_v42  ;;  %v3299_v60 = vmul.f32 %v3283_v38, %v5722_v11 }
0x1050   : > { %v3289_v55 = vadd.f32 1.0, %v4687_v43  ;;  %v3264_v2 = vmul.f32 0.7978846, %v3248_v53  ;;  %v3301_v63 = vmul.f32 %v3285_v30, %v5727_v8  ;;  %v3250_v51 = vadd.f32 %v3234_v27, %v5768_v10 }
0x1051   : > { %v3303_v0 = vmul.f32 %v3287_v52, %v3175_v1  ;;  %4696 = vtanh.f32 %v3260_v58  ;;  %v3262_v15 = vmul.f32 0.7978846, %v3246_v9  ;;  %v3243_v39 = vadd.f32 %v3227_v59, %v5733_v29 }
0x1052   : > { %v3305_v6 = vmul.f32 %v3289_v55, %v3177_v18  ;;  %4698 = vtanh.f32 %v3264_v2  ;;  %v3266_v36 = vmul.f32 0.7978846, %v3250_v51  ;;  %v3247_v23 = vadd.f32 %v3231_v48, %v5753_v57 }
0x1053   : > { %v3315_v13 = vpack.c.bf16 %v3303_v0, %v3299_v60  ;;  %4700 = vtanh.f32 %v3262_v15  ;;  %v3245_v11 = vadd.f32 %v3229_v45, %v5739_v31  ;;  %v3259_v19 = vmul.f32 0.7978846, %v3243_v39 }
0x1054   : > { %v3317_v17 = vpack.c.bf16 %v3305_v6, %v3301_v63  ;;  %4702 = vtanh.f32 %v3266_v36  ;;  %v3263_v8 = vmul.f32 0.7978846, %v3247_v23  ;;  %v3249_v18 = vadd.f32 %v3233_v54, %v5758_v62 }
0x1055   : > { %v4689_v1 = vpop.eup %4688  ;;  %v3172_v33 = vmul.f32 0.5, %v5707_v5  ;;  %v3261_v20 = vmul.f32 0.7978846, %v3245_v11  ;;  %v3176_v21 = vmul.f32 0.5, %v5714_v44  ;;  %4704 = vtanh.f32 %v3259_v19 }
0x1056   : > { %v4691_v4 = vpop.eup %4690  ;;  %v3284_v35 = vadd.f32 1.0, %v4689_v1  ;;  %v3265_v59 = vmul.f32 0.7978846, %v3249_v18  ;;  %4706 = vtanh.f32 %v3263_v8  ;;  %v3174_v40 = vmul.f32 0.5, %v5717_v34 }
0x1057   : > { %v3288_v3 = vadd.f32 1.0, %v4691_v4  ;;  %4708 = vtanh.f32 %v3261_v20  ;;  %v3178_v24 = vmul.f32 0.5, %v5720_v12  ;;  %v3180_v45 = vmul.f32 0.5, %v5744_v46 }
0x1058   : > { %v4693_v22 = vpop.eup %4692  ;;  %v3300_v25 = vmul.f32 %v3284_v35, %v3172_v33  ;;  %4710 = vtanh.f32 %v3265_v59  ;;  %v3184_v27 = vmul.f32 0.5, %v5765_v49  ;;  %v3182_v53 = vmul.f32 0.5, %v5750_v56 }
0x1059   : > { %v4695_v16 = vpop.eup %4694  ;;  %v3304_v61 = vmul.f32 %v3288_v3, %v3176_v21  ;;  %v3286_v28 = vadd.f32 1.0, %v4693_v22  ;;  %v3186_v54 = vmul.f32 0.5, %v5768_v10  ;;  %v3179_v63 = vmul.f32 0.5, %v5733_v29 }
0x105a   : > { %v3290_v26 = vadd.f32 1.0, %v4695_v16  ;;  %v3183_v6 = vmul.f32 0.5, %v5753_v57  ;;  %v3181_v56 = vmul.f32 0.5, %v5739_v31  ;;  %v3935_v57 = vld [vmem:[%s5917_s3] ss:$0 sm:$0xff] }
0x105b   : > { %v4697_v5 = vpop.eup %4696  ;;  %v3316_v7 = vpack.c.bf16 %v3304_v61, %v3300_v25  ;;  %v3302_v44 = vmul.f32 %v3286_v28, %v3174_v40 }
0x105c   : > { %v4699_v32 = vpop.eup %4698  ;;  %v3306_v38 = vmul.f32 %v3290_v26, %v3178_v24  ;;  %v3292_v37 = vadd.f32 1.0, %v4697_v5 }
0x105d   : > { %3618 = vmatprep.mubr.bf16.mxu0 %v3316_v7  ;;  %v3296_v30 = vadd.f32 1.0, %v4699_v32  ;;  %v4701_v42 = vpop.eup %4700 }
0x105e   : > { %v3318_v43 = vpack.c.bf16 %v3306_v38, %v3302_v44  ;;  %3619 = vmatmul.mubr.bf16.vlgmr.msra.gmra.mrb[84].mxu0 %v3315_v13  ;;  %v4703_v34 = vpop.eup %4702  ;;  %v3308_v48 = vmul.f32 %v3292_v37, %v3180_v45  ;;  %v3294_v52 = vadd.f32 1.0, %v4701_v42 }
0x105f   : > { %v3312_v12 = vmul.f32 %v3296_v30, %v3184_v27  ;;  %v3298_v55 = vadd.f32 1.0, %v4703_v34  ;;  %v4705_v58 = vpop.eup %4704 }
0x1060   : > { %3667 = vmatprep.mubr.bf16.mxu1 %v3318_v43  ;;  %v4707_v46 = vpop.eup %4706  ;;  %v3310_v0 = vmul.f32 %v3294_v52, %v3182_v53  ;;  %v3291_v2 = vadd.f32 1.0, %v4705_v58 }
0x1061   : > { %3668 = vmatmul.mubr.bf16.vlgmr.msra.gmra.mrb[76].mxu1 %v3317_v17  ;;  %v3320_v60 = vpack.c.bf16 %v3312_v12, %v3308_v48  ;;  %v3314_v49 = vmul.f32 %v3298_v55, %v3186_v54  ;;  %v4709_v9 = vpop.eup %4708  ;;  %v3295_v51 = vadd.f32 1.0, %v4707_v46  ;;  %v3185_v17 = vmul.f32 0.5, %v5758_v62 }
0x1062   : > { %v4711_v13 = vpop.eup %4710  ;;  %v3293_v10 = vadd.f32 1.0, %v4709_v9  ;;  %v3307_v36 = vmul.f32 %v3291_v2, %v3179_v63 }
0x1063   : > { %3626 = vmatprep.mubr.bf16.mxu0 %v3320_v60  ;;  %v3322_v15 = vpack.c.bf16 %v3314_v49, %v3310_v0  ;;  %v3311_v39 = vmul.f32 %v3295_v51, %v3183_v6  ;;  %v3297_v23 = vadd.f32 1.0, %v4711_v13 }
0x1064   : > { %v3309_v1 = vmul.f32 %v3293_v10, %v3181_v56 }
0x1065   : > { %3675 = vmatprep.mubr.bf16.mxu1 %v3322_v15  ;;  %v3319_v11 = vpack.c.bf16 %v3311_v39, %v3307_v36  ;;  %v3313_v19 = vmul.f32 %v3297_v23, %v3185_v17 }
0x1067   : > { %3627 = vmatmul.mubr.bf16.gmra.mrb[88].mxu0 %v3319_v11  ;;  %v3321_v8 = vpack.c.bf16 %v3313_v19, %v3309_v1 }
0x1069   : > { %3676 = vmatmul.mubr.bf16.gmra.mrb[80].mxu1 %v3321_v8 }
0x1131   : > { %v4075_v29 = vpop.f32.mrb[84].mxu0 }
0x1132   : > { %v4076_v18 = vpop.f32.mrb[85].mxu0 }
0x1133   : > { %v4077_v31 = vadd.f32 %v4076_v18, %v4075_v29  ;;  %v4078_v4 = vpop.f32.mrb[86].mxu0 }
0x1134   : > { %v4103_v33 = vpop.f32.mrb[76].mxu1  ;;  %v4079_v35 = vpop.f32.mrb[87].mxu0 }
0x1135   : > { %v3621_v62 = vadd.f32 %v4077_v31, %v3935_v57  ;;  %v4104_v20 = vpop.f32.mrb[77].mxu1  ;;  %v4080_v21 = vadd.f32 %v4079_v35, %v4078_v4 }
0x1136   : > { %v4105_v3 = vadd.f32 %v4104_v20, %v4103_v33  ;;  %v4106_v59 = vpop.f32.mrb[78].mxu1 }
0x1137   : > { %v3624_v22 = vadd.f32 %v4080_v21, %v3935_v57  ;;  %v4107_v16 = vpop.f32.mrb[79].mxu1 }
0x1138   : > { %v3670_v25 = vadd.f32 %v4105_v3, %v3621_v62  ;;  %v4108_v61 = vadd.f32 %v4107_v16, %v4106_v59 }
0x113a   : > { %v3684_v28 = vadd.f32 %v3670_v25, %v5646_v41  ;;  %v3673_v40 = vadd.f32 %v4108_v61, %v3624_v22  ;;  %v4081_v26 = vpop.f32.mrb[88].mxu0 }
0x113b   : > { %v4082_v5 = vpop.f32.mrb[89].mxu0 }
0x113c   : > { %3688 = vst [vmem:[%s489_s18] sm:$0xff] %v3684_v28  ;;  %v3685_v24 = vadd.f32 %v3673_v40, %v5649_v14  ;;  %v4109_v7 = vpop.f32.mrb[80].mxu1  ;;  %v4083_v32 = vadd.f32 %v4082_v5, %v4081_v26  ;;  %v4084_v44 = vpop.f32.mrb[90].mxu0 }
0x113d   : > { %v4110_v38 = vpop.f32.mrb[81].mxu1  ;;  %v4085_v37 = vpop.f32.mrb[91].mxu0 }
0x113e   : > { %3689 = vst [vmem:[%s489_s18 + $0x8] sm:$0xff] %v3685_v24  ;;  %v3629_v45 = vadd.f32 %v4083_v32, %v3935_v57  ;;  %v4111_v27 = vadd.f32 %v4110_v38, %v4109_v7  ;;  %v4112_v30 = vpop.f32.mrb[82].mxu1  ;;  %v4086_v41 = vadd.f32 %v4085_v37, %v4084_v44 }
0x113f   : > { %v4113_v42 = vpop.f32.mrb[83].mxu1 }
0x1140   : > { %v3678_v43 = vadd.f32 %v4111_v27, %v3629_v45  ;;  %v3632_v34 = vadd.f32 %v4086_v41, %v3935_v57  ;;  %v4114_v14 = vadd.f32 %v4113_v42, %v4112_v30 }
0x1142   : > { %v3686_v48 = vadd.f32 %v3678_v43, %v5653_v47  ;;  %v3681_v12 = vadd.f32 %v4114_v14, %v3632_v34 }
0x1144   : > { %3690 = vst [vmem:[%s489_s18 + $0x10] sm:$0xff] %v3686_v48  ;;  %v3687_v52 = vadd.f32 %v3681_v12, %v5658_v50 }
0x1146   : > { %3691 = vst [vmem:[%s489_s18 + $0x18] sm:$0xff] %v3687_v52 }
0x1147   : > { %4871 = shalt.err (!%p4868_p13)
}
0x1148   : > { %s4872_s16 = scalar_lea.hbm %s5831_s9, 512  ;;  %s4876_s18 = scalar_lea.hbm %s5918_s14, 1024 }
0x1149   : > { %p4873_p9 = scmp.ne.s32.totalorder %s5831_s9, %s4872_s16  ;;  %p4877_p4 = scmp.lt.u32.totalorder %s5831_s9, %s5918_s14 }
0x114a   : > { %p4878_p8 = scmp.lt.u32.totalorder %s4876_s18, %s4872_s16  ;;  %p4880_p3 = scmp.lt.u32.totalorder %s4872_s16, %s5831_s9 }
0x114b   : > { %p4874_p0 = pnand %p4873_p9, %p5177_p10 }
0x114c   : > { %p4879_p6 = por %p4878_p8, %p4877_p4 }
0x114d   : > { %p4875_p11 = pneg %p4874_p0 }
0x114e   : > { %p4881_p5 = por %p4880_p3, %p4879_p6 }
0x1150   : > { %p4882_p7 = pnand %p4881_p5, %p4875_p11 }
0x1152   : > { %4885 = shalt.err (!%p4882_p7)
}
0x1153   : > { %s4954_s12 = smov 128   ;;  %s4955_s27 = smov 8  }
0x1154   : > { %4365 = dma.vmem_to_hbm [thread:$0]  (%p5177_p10), %s5825_s13, 512, %s5831_s9, %s3693_s26, %s4954_s12, %s4954_s12, %s4955_s27  }
0x1155 PF: > { %s5919_s25 = sld [smem:[#allocation16_spill]]  ;;  %s5920_s29 = sld [smem:[#allocation17_spill]] }
0x1156   : > { %p5922_p2 = scmp.ge.s32.totalorder %s4932_s24, 2 }
0x115b   : > { %s3721_s17 = sand.u32 1, %s5919_s25   ;;  %p5921_p12 = scmp.ne.s32.totalorder %s5920_s29, 0 }
0x115c   : > { %s3722_s16 = scalar_lea.sflag [#allocation4], %s3721_s17 }
0x115d   : > { %p4385_p1 = pnand %p5922_p2, %p5921_p12 }
0x115f   : > { %4915 = dma.done.wait (!%p4385_p1), %s3722_s16, 512  }
0x1160   : > { %4917 = vsyncadd (!%p4385_p1), %s3722_s16, 4294966784  ;;  %p27_p13 = scmp.ge.s32.totalorder %s5167_s30, 4   ;;  %s5923_s21 = smov %s4924_s22 }
0x1161   : > { %s5924_s22 = smov %s4928_s23  ;;  %s5925_s23 = smov %s5183_s20 }
0x1162   : > { %s5926_s24 = smov %s5167_s30  ;;  %29 = sbr.rel (!%p27_p13) target bundleno = 12 (0xc), region = 129 }
0x1169   :  { %3727 = vsyncpa [#allocation3], 1 }
0x116a   :  { %3729 = vsyncpa [#allocation3 + $0x1], 1 }
0x116b   :  { %3730 = vsyncpa [#allocation6], 1 }
0x116c   :  { %3731 = vsyncpa [#allocation9], 1 }
0x116d   :  { %3732 = vsyncpa [#allocation4], 1 }
0x116e   :  { %3734 = vsyncpa [#allocation4 + $0x1], 1 }

</bundles_post_ra>
